<compile_context>
chip_gen: v7x
topology: tpu7x:2x2x1
jax: 0.10.0
libtpu: 0.0.40
codegen_flags: <defaults>
</compile_context>

<pallas_src>
import functools

import jax
import jax.numpy as jnp
from jax.experimental import pallas as pl
from jax.experimental.pallas import tpu as pltpu


def _round_up(x, m):
    return ((x + m - 1) // m) * m


def _choose_tm(M):
    """Row-tile size: big tiles for bandwidth, >=2 grid steps on large layers."""
    if M <= 256:
        return _round_up(M, 16)            # single block; tiny layer
    return min(512, _round_up(M // 2, 128))  # >=2 steps (megacore), <=512 rows


# ---------------------------------------------------------------------------
# Pallas kernel: fused (im2col-matmul + per-output-channel shift + activation)
#   x_ref:     (TM, Kp)  bf16 patch tile
#   w_ref:     (Kp, Np)  bf16 weight (BN scale pre-folded, zero padded)
#   shift_ref: (1,  Np)  f32 folded BN shift
# ---------------------------------------------------------------------------
def _fused_conv_matmul_kernel(x_ref, w_ref, shift_ref, o_ref, *, act):
    y = jnp.dot(x_ref[...], w_ref[...], preferred_element_type=jnp.float32)
    y = y + shift_ref[...]
    if act == "leaky":
        y = jnp.where(y >= 0.0, y, 0.2 * y)
    elif act == "sigmoid":
        y = jax.nn.sigmoid(y)
    o_ref[...] = y.astype(o_ref.dtype)


def fused_conv_matmul(patches, w_pad, shift_pad, act, out_dtype):
    """patches: (M, K) bf16, w_pad: (Kp, Np) bf16, shift_pad: (1, Np) f32."""
    M, K = patches.shape
    Kp, Np = w_pad.shape
    TM = _choose_tm(M)
    Mp = _round_up(M, TM)
    if (Mp, Kp) != (M, K):
        patches = jnp.pad(patches, ((0, Mp - M), (0, Kp - K)))

    out = pl.pallas_call(
        functools.partial(_fused_conv_matmul_kernel, act=act),
        out_shape=jax.ShapeDtypeStruct((Mp, Np), out_dtype),
        grid=(Mp // TM,),
        in_specs=[
            pl.BlockSpec((TM, Kp), lambda i: (i, 0)),
            pl.BlockSpec((Kp, Np), lambda i: (0, 0)),
            pl.BlockSpec((1, Np), lambda i: (0, 0)),
        ],
        out_specs=pl.BlockSpec((TM, Np), lambda i: (i, 0)),
        compiler_params=pltpu.CompilerParams(dimension_semantics=("parallel",)),
    )(patches, w_pad, shift_pad)
    return out


# ---------------------------------------------------------------------------
# NHWC im2col glue: no transposes, column order (kh, kw, cin) matches the
# weight layout produced in _prep_layer.
# ---------------------------------------------------------------------------
def im2col_nhwc(x, k, s, p):
    N, H, W, C = x.shape
    if p:
        x = jnp.pad(x, ((0, 0), (p, p), (p, p), (0, 0)))
    Ho = (H + 2 * p - k) // s + 1
    Wo = (W + 2 * p - k) // s + 1
    cols = [x[:, i:i + s * Ho:s, j:j + s * Wo:s, :]
            for i in range(k) for j in range(k)]
    cols = jnp.concatenate(cols, axis=-1)                 # (N, Ho, Wo, k*k*C)
    return cols.reshape(N * Ho * Wo, k * k * C), Ho, Wo


def conv_block(x_nhwc, layer, cout, act, stride, pad, out_dtype, k=4):
    N = x_nhwc.shape[0]
    patches, Ho, Wo = im2col_nhwc(x_nhwc, k, stride, pad)
    y = fused_conv_matmul(patches, layer["w"], layer["shift"], act, out_dtype)
    y = y[: N * Ho * Wo, :cout]
    return y.reshape(N, Ho, Wo, cout)


# ---------------------------------------------------------------------------
# Parameter prep: fold BN scale into weight, pre-pad to lane-aligned shapes,
# store weights in bf16 (MXU-native) once at init.
# ---------------------------------------------------------------------------
def _prep_layer(w_oihw, gamma, beta, rmean, rvar, eps=1e-5):
    Cout, Cin, kh, kw = w_oihw.shape
    if gamma is not None:
        scale = gamma / jnp.sqrt(rvar + eps)
        shift = beta - rmean * scale
    else:
        scale = jnp.ones((Cout,), jnp.float32)
        shift = jnp.zeros((Cout,), jnp.float32)
    # (Cout, Cin, kh, kw) -> (kh, kw, Cin, Cout) -> (kh*kw*Cin, Cout)
    w_t = jnp.transpose(w_oihw, (2, 3, 1, 0)).reshape(kh * kw * Cin, Cout)
    w_t = w_t * scale[None, :]                       # fold BN scale
    K = kh * kw * Cin
    Kp = _round_up(K, 128)
    Np = _round_up(Cout, 128)
    w_pad = jnp.pad(w_t, ((0, Kp - K), (0, Np - Cout))).astype(jnp.bfloat16)
    shift_pad = jnp.pad(shift.reshape(1, -1), ((0, 0), (0, Np - Cout)))
    return {"w": w_pad, "shift": shift_pad}


def build_discriminator(key, num_channels, fm, use_sigmoid):
    # (cin, cout, stride, pad, has_bn, act) — DCGAN discriminator, image_size=64
    specs = [
        (num_channels, fm,     2, 1, False, "leaky"),
        (fm,           2 * fm, 2, 1, True,  "leaky"),
        (2 * fm,       4 * fm, 2, 1, True,  "leaky"),
        (4 * fm,       8 * fm, 2, 1, True,  "leaky"),
        (8 * fm,       1,      1, 0, False, "sigmoid" if use_sigmoid else "none"),
    ]
    params = []
    for (cin, cout, stride, pad, has_bn, act) in specs:
        key, kw_, kg_ = jax.random.split(key, 3)
        w = 0.02 * jax.random.normal(kw_, (cout, cin, 4, 4), jnp.float32)
        if has_bn:
            gamma = 1.0 + 0.02 * jax.random.normal(kg_, (cout,), jnp.float32)
            beta = jnp.zeros((cout,), jnp.float32)
            rmean = jnp.zeros((cout,), jnp.float32)
            rvar = jnp.ones((cout,), jnp.float32)
        else:
            gamma = beta = rmean = rvar = None
        params.append(_prep_layer(w, gamma, beta, rmean, rvar))

    @jax.jit
    def forward(params, x_nchw):
        # NCHW -> NHWC once; bf16 activations end-to-end (f32 accumulate in MXU).
        x = jnp.transpose(x_nchw, (0, 2, 3, 1)).astype(jnp.bfloat16)
        last = len(specs) - 1
        for idx, (p, (cin, cout, stride, pad, has_bn, act)) in enumerate(
                zip(params, specs)):
            out_dtype = jnp.float32 if idx == last else jnp.bfloat16
            x = conv_block(x, p, cout, act, stride, pad, out_dtype)
        N = x.shape[0]
        return x.reshape(N, 1, 1, 1)   # (N, 1, 1, 1), matches PyTorch NCHW output

    return params, forward


if __name__ == "__main__":
    key = jax.random.PRNGKey(0)
    k_in, k_par = jax.random.split(key)

    batch = 2
    num_channels = 3
    feat_maps_size = 8
    image_size = 64
    use_sigmoid = True

    x = jax.random.normal(k_in, (batch, num_channels, image_size, image_size),
                          jnp.float32)
    params, forward = build_discriminator(k_par, num_channels, feat_maps_size,
                                          use_sigmoid)

    out = forward(params, x)
    out = jax.block_until_ready(out)

    assert out.shape == (batch, 1, 1, 1), out.shape
    assert out.dtype == jnp.float32
    assert bool(jnp.all(jnp.isfinite(out)))
    if use_sigmoid:
        assert bool(jnp.all((out >= 0.0) & (out <= 1.0)))
    print("KERNEL_OK")
</pallas_src>

<mosaic_0001>
module attributes {stable_mosaic.version = 11 : i64} {
  func.func @_fused_conv_matmul_kernel(%arg0: i32, %arg1: memref<512x128xbf16, #tpu.memory_space<vmem>>, %arg2: memref<128x128xbf16, #tpu.memory_space<vmem>>, %arg3: memref<1x128xf32, #tpu.memory_space<vmem>>, %arg4: memref<512x128xbf16, #tpu.memory_space<vmem>>) attributes {dimension_semantics = [#tpu.dimension_semantics<parallel>], iteration_bounds = array<i64: 4>, scalar_prefetch = 0 : i64, scratch_operands = 0 : i64, tpu.core_type = #tpu.core_type<tc>, window_params = [{transform_indices = @transform_0, window_bounds = array<i64: 512, 128>}, {pipeline_mode = #tpu.pipeline_mode<synchronous>, transform_indices = @transform_1, window_bounds = array<i64: 128, 128>}, {pipeline_mode = #tpu.pipeline_mode<synchronous>, transform_indices = @transform_2, window_bounds = array<i64: 1, 128>}, {transform_indices = @transform_3, window_bounds = array<i64: 512, 128>}]} {
    %c0 = arith.constant 0 : index
    %c0_0 = arith.constant 0 : index
    %0 = vector.load %arg1[%c0, %c0_0] : memref<512x128xbf16, #tpu.memory_space<vmem>>, vector<512x128xbf16>
    %c0_1 = arith.constant 0 : index
    %c0_2 = arith.constant 0 : index
    %1 = vector.load %arg2[%c0_1, %c0_2] : memref<128x128xbf16, #tpu.memory_space<vmem>>, vector<128x128xbf16>
    %cst = arith.constant dense<0.000000e+00> : vector<512x128xf32>
    %2 = tpu.matmul %0, %1, %cst {dimension_numbers = #tpu.dot_dimension_numbers<[1], [0], [0], [1], [0, 0, 1, 1], [], []>} : vector<512x128xbf16>, vector<128x128xbf16>, vector<512x128xf32> -> vector<512x128xf32>
    %c0_3 = arith.constant 0 : index
    %c0_4 = arith.constant 0 : index
    %3 = vector.load %arg3[%c0_3, %c0_4] : memref<1x128xf32, #tpu.memory_space<vmem>>, vector<1x128xf32>
    %4 = vector.broadcast %3 : vector<1x128xf32> to vector<512x128xf32>
    %5 = arith.addf %2, %4 : vector<512x128xf32>
    %cst_5 = arith.constant 0.000000e+00 : f32
    %6 = vector.broadcast %cst_5 : f32 to vector<512x128xf32>
    %7 = arith.cmpf oge, %5, %6 : vector<512x128xf32>
    %cst_6 = arith.constant 2.000000e-01 : f32
    %8 = vector.broadcast %cst_6 : f32 to vector<512x128xf32>
    %9 = arith.mulf %8, %5 : vector<512x128xf32>
    %10 = arith.select %7, %5, %9 : vector<512x128xi1>, vector<512x128xf32>
    %11 = arith.truncf %10 : vector<512x128xf32> to vector<512x128xbf16>
    %c0_7 = arith.constant 0 : index
    %c0_8 = arith.constant 0 : index
    %12 = vector.load %arg4[%c0_7, %c0_8] : memref<512x128xbf16, #tpu.memory_space<vmem>>, vector<512x128xbf16>
    tpu.vector_store %arg4[%c0_7, %c0_8], %11 {strides = array<i32>} : memref<512x128xbf16, #tpu.memory_space<vmem>>, vector<512x128xbf16>,
    return
  }
  func.func @transform_0(%arg0: i32) -> (i32, i32) {
    %c0_i32 = arith.constant 0 : i32
    %c0_i32_0 = arith.constant 0 : i32
    return %arg0, %c0_i32 : i32, i32
  }
  func.func @transform_1(%arg0: i32) -> (i32, i32) {
    %c0_i32 = arith.constant 0 : i32
    %c0_i32_0 = arith.constant 0 : i32
    %c0_i32_1 = arith.constant 0 : i32
    return %c0_i32, %c0_i32_0 : i32, i32
  }
  func.func @transform_2(%arg0: i32) -> (i32, i32) {
    %c0_i32 = arith.constant 0 : i32
    %c0_i32_0 = arith.constant 0 : i32
    %c0_i32_1 = arith.constant 0 : i32
    return %c0_i32, %c0_i32_0 : i32, i32
  }
  func.func @transform_3(%arg0: i32) -> (i32, i32) {
    %c0_i32 = arith.constant 0 : i32
    %c0_i32_0 = arith.constant 0 : i32
    return %arg0, %c0_i32 : i32, i32
  }
}

module attributes {stable_mosaic.version = 11 : i64} {
  func.func @_fused_conv_matmul_kernel(%arg0: i32, %arg1: memref<256x128xbf16, #tpu.memory_space<vmem>>, %arg2: memref<128x128xbf16, #tpu.memory_space<vmem>>, %arg3: memref<1x128xf32, #tpu.memory_space<vmem>>, %arg4: memref<256x128xbf16, #tpu.memory_space<vmem>>) attributes {dimension_semantics = [#tpu.dimension_semantics<parallel>], iteration_bounds = array<i64: 2>, scalar_prefetch = 0 : i64, scratch_operands = 0 : i64, tpu.core_type = #tpu.core_type<tc>, window_params = [{transform_indices = @transform_0, window_bounds = array<i64: 256, 128>}, {pipeline_mode = #tpu.pipeline_mode<synchronous>, transform_indices = @transform_1, window_bounds = array<i64: 128, 128>}, {pipeline_mode = #tpu.pipeline_mode<synchronous>, transform_indices = @transform_2, window_bounds = array<i64: 1, 128>}, {transform_indices = @transform_3, window_bounds = array<i64: 256, 128>}]} {
    %c0 = arith.constant 0 : index
    %c0_0 = arith.constant 0 : index
    %0 = vector.load %arg1[%c0, %c0_0] : memref<256x128xbf16, #tpu.memory_space<vmem>>, vector<256x128xbf16>
    %c0_1 = arith.constant 0 : index
    %c0_2 = arith.constant 0 : index
    %1 = vector.load %arg2[%c0_1, %c0_2] : memref<128x128xbf16, #tpu.memory_space<vmem>>, vector<128x128xbf16>
    %cst = arith.constant dense<0.000000e+00> : vector<256x128xf32>
    %2 = tpu.matmul %0, %1, %cst {dimension_numbers = #tpu.dot_dimension_numbers<[1], [0], [0], [1], [0, 0, 1, 1], [], []>} : vector<256x128xbf16>, vector<128x128xbf16>, vector<256x128xf32> -> vector<256x128xf32>
    %c0_3 = arith.constant 0 : index
    %c0_4 = arith.constant 0 : index
    %3 = vector.load %arg3[%c0_3, %c0_4] : memref<1x128xf32, #tpu.memory_space<vmem>>, vector<1x128xf32>
    %4 = vector.broadcast %3 : vector<1x128xf32> to vector<256x128xf32>
    %5 = arith.addf %2, %4 : vector<256x128xf32>
    %cst_5 = arith.constant 0.000000e+00 : f32
    %6 = vector.broadcast %cst_5 : f32 to vector<256x128xf32>
    %7 = arith.cmpf oge, %5, %6 : vector<256x128xf32>
    %cst_6 = arith.constant 2.000000e-01 : f32
    %8 = vector.broadcast %cst_6 : f32 to vector<256x128xf32>
    %9 = arith.mulf %8, %5 : vector<256x128xf32>
    %10 = arith.select %7, %5, %9 : vector<256x128xi1>, vector<256x128xf32>
    %11 = arith.truncf %10 : vector<256x128xf32> to vector<256x128xbf16>
    %c0_7 = arith.constant 0 : index
    %c0_8 = arith.constant 0 : index
    %12 = vector.load %arg4[%c0_7, %c0_8] : memref<256x128xbf16, #tpu.memory_space<vmem>>, vector<256x128xbf16>
    tpu.vector_store %arg4[%c0_7, %c0_8], %11 {strides = array<i32>} : memref<256x128xbf16, #tpu.memory_space<vmem>>, vector<256x128xbf16>,
    return
  }
  func.func @transform_0(%arg0: i32) -> (i32, i32) {
    %c0_i32 = arith.constant 0 : i32
    %c0_i32_0 = arith.constant 0 : i32
    return %arg0, %c0_i32 : i32, i32
  }
  func.func @transform_1(%arg0: i32) -> (i32, i32) {
    %c0_i32 = arith.constant 0 : i32
    %c0_i32_0 = arith.constant 0 : i32
    %c0_i32_1 = arith.constant 0 : i32
    return %c0_i32, %c0_i32_0 : i32, i32
  }
  func.func @transform_2(%arg0: i32) -> (i32, i32) {
    %c0_i32 = arith.constant 0 : i32
    %c0_i32_0 = arith.constant 0 : i32
    %c0_i32_1 = arith.constant 0 : i32
    return %c0_i32, %c0_i32_0 : i32, i32
  }
  func.func @transform_3(%arg0: i32) -> (i32, i32) {
    %c0_i32 = arith.constant 0 : i32
    %c0_i32_0 = arith.constant 0 : i32
    return %arg0, %c0_i32 : i32, i32
  }
}

module attributes {stable_mosaic.version = 11 : i64} {
  func.func @_fused_conv_matmul_kernel(%arg0: i32, %arg1: memref<128x256xbf16, #tpu.memory_space<vmem>>, %arg2: memref<256x128xbf16, #tpu.memory_space<vmem>>, %arg3: memref<1x128xf32, #tpu.memory_space<vmem>>, %arg4: memref<128x128xbf16, #tpu.memory_space<vmem>>) attributes {dimension_semantics = [#tpu.dimension_semantics<parallel>], iteration_bounds = array<i64: 1>, scalar_prefetch = 0 : i64, scratch_operands = 0 : i64, tpu.core_type = #tpu.core_type<tc>, window_params = [{transform_indices = @transform_0, window_bounds = array<i64: 128, 256>}, {pipeline_mode = #tpu.pipeline_mode<synchronous>, transform_indices = @transform_1, window_bounds = array<i64: 256, 128>}, {pipeline_mode = #tpu.pipeline_mode<synchronous>, transform_indices = @transform_2, window_bounds = array<i64: 1, 128>}, {transform_indices = @transform_3, window_bounds = array<i64: 128, 128>}]} {
    %c0 = arith.constant 0 : index
    %c0_0 = arith.constant 0 : index
    %0 = vector.load %arg1[%c0, %c0_0] : memref<128x256xbf16, #tpu.memory_space<vmem>>, vector<128x256xbf16>
    %c0_1 = arith.constant 0 : index
    %c0_2 = arith.constant 0 : index
    %1 = vector.load %arg2[%c0_1, %c0_2] : memref<256x128xbf16, #tpu.memory_space<vmem>>, vector<256x128xbf16>
    %cst = arith.constant dense<0.000000e+00> : vector<128x128xf32>
    %2 = tpu.matmul %0, %1, %cst {dimension_numbers = #tpu.dot_dimension_numbers<[1], [0], [0], [1], [0, 0, 1, 1], [], []>} : vector<128x256xbf16>, vector<256x128xbf16>, vector<128x128xf32> -> vector<128x128xf32>
    %c0_3 = arith.constant 0 : index
    %c0_4 = arith.constant 0 : index
    %3 = vector.load %arg3[%c0_3, %c0_4] : memref<1x128xf32, #tpu.memory_space<vmem>>, vector<1x128xf32>
    %4 = vector.broadcast %3 : vector<1x128xf32> to vector<128x128xf32>
    %5 = arith.addf %2, %4 : vector<128x128xf32>
    %cst_5 = arith.constant 0.000000e+00 : f32
    %6 = vector.broadcast %cst_5 : f32 to vector<128x128xf32>
    %7 = arith.cmpf oge, %5, %6 : vector<128x128xf32>
    %cst_6 = arith.constant 2.000000e-01 : f32
    %8 = vector.broadcast %cst_6 : f32 to vector<128x128xf32>
    %9 = arith.mulf %8, %5 : vector<128x128xf32>
    %10 = arith.select %7, %5, %9 : vector<128x128xi1>, vector<128x128xf32>
    %11 = arith.truncf %10 : vector<128x128xf32> to vector<128x128xbf16>
    %c0_7 = arith.constant 0 : index
    %c0_8 = arith.constant 0 : index
    %12 = vector.load %arg4[%c0_7, %c0_8] : memref<128x128xbf16, #tpu.memory_space<vmem>>, vector<128x128xbf16>
    tpu.vector_store %arg4[%c0_7, %c0_8], %11 {strides = array<i32>} : memref<128x128xbf16, #tpu.memory_space<vmem>>, vector<128x128xbf16>,
    return
  }
  func.func @transform_0(%arg0: i32) -> (i32, i32) {
    %c0_i32 = arith.constant 0 : i32
    %c0_i32_0 = arith.constant 0 : i32
    return %arg0, %c0_i32 : i32, i32
  }
  func.func @transform_1(%arg0: i32) -> (i32, i32) {
    %c0_i32 = arith.constant 0 : i32
    %c0_i32_0 = arith.constant 0 : i32
    %c0_i32_1 = arith.constant 0 : i32
    return %c0_i32, %c0_i32_0 : i32, i32
  }
  func.func @transform_2(%arg0: i32) -> (i32, i32) {
    %c0_i32 = arith.constant 0 : i32
    %c0_i32_0 = arith.constant 0 : i32
    %c0_i32_1 = arith.constant 0 : i32
    return %c0_i32, %c0_i32_0 : i32, i32
  }
  func.func @transform_3(%arg0: i32) -> (i32, i32) {
    %c0_i32 = arith.constant 0 : i32
    %c0_i32_0 = arith.constant 0 : i32
    return %arg0, %c0_i32 : i32, i32
  }
}

module attributes {stable_mosaic.version = 11 : i64} {
  func.func @_fused_conv_matmul_kernel(%arg0: i32, %arg1: memref<32x512xbf16, #tpu.memory_space<vmem>>, %arg2: memref<512x128xbf16, #tpu.memory_space<vmem>>, %arg3: memref<1x128xf32, #tpu.memory_space<vmem>>, %arg4: memref<32x128xbf16, #tpu.memory_space<vmem>>) attributes {dimension_semantics = [#tpu.dimension_semantics<parallel>], iteration_bounds = array<i64: 1>, scalar_prefetch = 0 : i64, scratch_operands = 0 : i64, tpu.core_type = #tpu.core_type<tc>, window_params = [{transform_indices = @transform_0, window_bounds = array<i64: 32, 512>}, {pipeline_mode = #tpu.pipeline_mode<synchronous>, transform_indices = @transform_1, window_bounds = array<i64: 512, 128>}, {pipeline_mode = #tpu.pipeline_mode<synchronous>, transform_indices = @transform_2, window_bounds = array<i64: 1, 128>}, {transform_indices = @transform_3, window_bounds = array<i64: 32, 128>}]} {
    %c0 = arith.constant 0 : index
    %c0_0 = arith.constant 0 : index
    %0 = vector.load %arg1[%c0, %c0_0] : memref<32x512xbf16, #tpu.memory_space<vmem>>, vector<32x512xbf16>
    %c0_1 = arith.constant 0 : index
    %c0_2 = arith.constant 0 : index
    %1 = vector.load %arg2[%c0_1, %c0_2] : memref<512x128xbf16, #tpu.memory_space<vmem>>, vector<512x128xbf16>
    %cst = arith.constant dense<0.000000e+00> : vector<32x128xf32>
    %2 = tpu.matmul %0, %1, %cst {dimension_numbers = #tpu.dot_dimension_numbers<[1], [0], [0], [1], [0, 0, 1, 1], [], []>} : vector<32x512xbf16>, vector<512x128xbf16>, vector<32x128xf32> -> vector<32x128xf32>
    %c0_3 = arith.constant 0 : index
    %c0_4 = arith.constant 0 : index
    %3 = vector.load %arg3[%c0_3, %c0_4] : memref<1x128xf32, #tpu.memory_space<vmem>>, vector<1x128xf32>
    %4 = vector.broadcast %3 : vector<1x128xf32> to vector<32x128xf32>
    %5 = arith.addf %2, %4 : vector<32x128xf32>
    %cst_5 = arith.constant 0.000000e+00 : f32
    %6 = vector.broadcast %cst_5 : f32 to vector<32x128xf32>
    %7 = arith.cmpf oge, %5, %6 : vector<32x128xf32>
    %cst_6 = arith.constant 2.000000e-01 : f32
    %8 = vector.broadcast %cst_6 : f32 to vector<32x128xf32>
    %9 = arith.mulf %8, %5 : vector<32x128xf32>
    %10 = arith.select %7, %5, %9 : vector<32x128xi1>, vector<32x128xf32>
    %11 = arith.truncf %10 : vector<32x128xf32> to vector<32x128xbf16>
    %c0_7 = arith.constant 0 : index
    %c0_8 = arith.constant 0 : index
    %12 = vector.load %arg4[%c0_7, %c0_8] : memref<32x128xbf16, #tpu.memory_space<vmem>>, vector<32x128xbf16>
    tpu.vector_store %arg4[%c0_7, %c0_8], %11 {strides = array<i32>} : memref<32x128xbf16, #tpu.memory_space<vmem>>, vector<32x128xbf16>,
    return
  }
  func.func @transform_0(%arg0: i32) -> (i32, i32) {
    %c0_i32 = arith.constant 0 : i32
    %c0_i32_0 = arith.constant 0 : i32
    return %arg0, %c0_i32 : i32, i32
  }
  func.func @transform_1(%arg0: i32) -> (i32, i32) {
    %c0_i32 = arith.constant 0 : i32
    %c0_i32_0 = arith.constant 0 : i32
    %c0_i32_1 = arith.constant 0 : i32
    return %c0_i32, %c0_i32_0 : i32, i32
  }
  func.func @transform_2(%arg0: i32) -> (i32, i32) {
    %c0_i32 = arith.constant 0 : i32
    %c0_i32_0 = arith.constant 0 : i32
    %c0_i32_1 = arith.constant 0 : i32
    return %c0_i32, %c0_i32_0 : i32, i32
  }
  func.func @transform_3(%arg0: i32) -> (i32, i32) {
    %c0_i32 = arith.constant 0 : i32
    %c0_i32_0 = arith.constant 0 : i32
    return %arg0, %c0_i32 : i32, i32
  }
}

module attributes {stable_mosaic.version = 11 : i64} {
  func.func @_fused_conv_matmul_kernel(%arg0: i32, %arg1: memref<16x1024xbf16, #tpu.memory_space<vmem>>, %arg2: memref<1024x128xbf16, #tpu.memory_space<vmem>>, %arg3: memref<1x128xf32, #tpu.memory_space<vmem>>, %arg4: memref<16x128xf32, #tpu.memory_space<vmem>>) attributes {dimension_semantics = [#tpu.dimension_semantics<parallel>], iteration_bounds = array<i64: 1>, scalar_prefetch = 0 : i64, scratch_operands = 0 : i64, tpu.core_type = #tpu.core_type<tc>, window_params = [{transform_indices = @transform_0, window_bounds = array<i64: 16, 1024>}, {pipeline_mode = #tpu.pipeline_mode<synchronous>, transform_indices = @transform_1, window_bounds = array<i64: 1024, 128>}, {pipeline_mode = #tpu.pipeline_mode<synchronous>, transform_indices = @transform_2, window_bounds = array<i64: 1, 128>}, {transform_indices = @transform_3, window_bounds = array<i64: 16, 128>}]} {
    %c0 = arith.constant 0 : index
    %c0_0 = arith.constant 0 : index
    %0 = vector.load %arg1[%c0, %c0_0] : memref<16x1024xbf16, #tpu.memory_space<vmem>>, vector<16x1024xbf16>
    %c0_1 = arith.constant 0 : index
    %c0_2 = arith.constant 0 : index
    %1 = vector.load %arg2[%c0_1, %c0_2] : memref<1024x128xbf16, #tpu.memory_space<vmem>>, vector<1024x128xbf16>
    %cst = arith.constant dense<0.000000e+00> : vector<16x128xf32>
    %2 = tpu.matmul %0, %1, %cst {dimension_numbers = #tpu.dot_dimension_numbers<[1], [0], [0], [1], [0, 0, 1, 1], [], []>} : vector<16x1024xbf16>, vector<1024x128xbf16>, vector<16x128xf32> -> vector<16x128xf32>
    %c0_3 = arith.constant 0 : index
    %c0_4 = arith.constant 0 : index
    %3 = vector.load %arg3[%c0_3, %c0_4] : memref<1x128xf32, #tpu.memory_space<vmem>>, vector<1x128xf32>
    %4 = vector.broadcast %3 : vector<1x128xf32> to vector<16x128xf32>
    %5 = arith.addf %2, %4 : vector<16x128xf32>
    %6 = arith.negf %5 : vector<16x128xf32>
    %7 = math.exp %6 : vector<16x128xf32>
    %cst_5 = arith.constant 1.000000e+00 : f32
    %8 = vector.broadcast %cst_5 : f32 to vector<16x128xf32>
    %9 = arith.addf %8, %7 : vector<16x128xf32>
    %10 = arith.divf %8, %9 : vector<16x128xf32>
    %c0_6 = arith.constant 0 : index
    %c0_7 = arith.constant 0 : index
    %11 = vector.load %arg4[%c0_6, %c0_7] : memref<16x128xf32, #tpu.memory_space<vmem>>, vector<16x128xf32>
    tpu.vector_store %arg4[%c0_6, %c0_7], %10 {strides = array<i32>} : memref<16x128xf32, #tpu.memory_space<vmem>>, vector<16x128xf32>,
    return
  }
  func.func @transform_0(%arg0: i32) -> (i32, i32) {
    %c0_i32 = arith.constant 0 : i32
    %c0_i32_0 = arith.constant 0 : i32
    return %arg0, %c0_i32 : i32, i32
  }
  func.func @transform_1(%arg0: i32) -> (i32, i32) {
    %c0_i32 = arith.constant 0 : i32
    %c0_i32_0 = arith.constant 0 : i32
    %c0_i32_1 = arith.constant 0 : i32
    return %c0_i32, %c0_i32_0 : i32, i32
  }
  func.func @transform_2(%arg0: i32) -> (i32, i32) {
    %c0_i32 = arith.constant 0 : i32
    %c0_i32_0 = arith.constant 0 : i32
    %c0_i32_1 = arith.constant 0 : i32
    return %c0_i32, %c0_i32_0 : i32, i32
  }
  func.func @transform_3(%arg0: i32) -> (i32, i32) {
    %c0_i32 = arith.constant 0 : i32
    %c0_i32_0 = arith.constant 0 : i32
    return %arg0, %c0_i32 : i32, i32
  }
}

</mosaic_0001>

<bundles_post_ra>
// kernel: forward.5
= control target key start
LH: loop header
LB: loop body
LE: loop exit
PB: predicated region body
PF: predicated region fallthrough
CT: control target
= control target key end

     0   :  { %s1942_s12 = smov 0   ;;  %s2136_s0 = inlined_call_operand.vmem [shape: bf16[2048,128], index: 0, kind: input, shape index: {}]   ;;  %s2137_s1 = inlined_call_operand.vmem [shape: bf16[128,128], index: 1, kind: input, shape index: {}]   ;;  %s2138_s2 = inlined_call_operand.vmem [shape: f32[1,128], index: 2, kind: input, shape index: {}]   ;;  %s2139_s3 = inlined_call_operand.vmem [shape: bf16[2048,128], index: 3, kind: output, shape index: {}]  }
   0x1 LB: > { %s1359_s13 = sadd.s32 4294967295, %s1920_s12   ;;  %p1363_p0 = scmp.ge.s32.totalorder %s1920_s12, 1  ;;  %s1920_s12 = sphi %s1942_s12, %s13_s12  }
   0x2   : > { %p138_p1 = scmp.lt.s32.totalorder %s1920_s12, 5 }
   0x4   : > { %p139_p2 = pnand %p1363_p0, %p138_p1 }
   0x5   : > { %v1874_v0 = vld [vmem:[%s2137_s1] sm:$0xff] (!%p139_p2)   ;;  %s1364_s16 = sshll.u32 (!%p139_p2), %s1359_s13, 6  ;;  %v1875_v1 = vld [vmem:[%s2137_s1 + $0x8] sm:$0xff] (!%p139_p2)   ;;  %v1876_v2 = vld [vmem:[%s2137_s1 + $0x10] sm:$0xff] (!%p139_p2)  }
   0x6   : > { %142 = sbr.rel (%p139_p2) target bundleno = 327 (0x147), region = 32  ;;  %p163_p3 = scmp.lt.s32.totalorder (!%p139_p2), %s1364_s16, 255  ;;  %1770 = vmatprep.subr.bf16.mxu0 (!%p139_p2), %v1874_v0  ;;  %1850 = vmatprep.subr.bf16.mxu1 (!%p139_p2), %v1874_v0  ;;  %v1877_v3 = vld [vmem:[%s2137_s1 + $0x18] sm:$0xff] (!%p139_p2)   ;;  %v1878_v6 = vld [vmem:[%s2137_s1 + $0x20] sm:$0xff] (!%p139_p2)   ;;  %v1879_v7 = vld [vmem:[%s2137_s1 + $0x28] sm:$0xff] (!%p139_p2)  }
   0x7   : > { %1771 = vmatpush3.bf16.msra.mxu0 (!%p139_p2), %v1874_v0  ;;  %1858 = vmatpush3.bf16.msra.mxu1 (!%p139_p2), %v1874_v0  ;;  %v1880_v8 = vld [vmem:[%s2137_s1 + $0x30] sm:$0xff] (!%p139_p2)   ;;  %v1881_v9 = vld [vmem:[%s2137_s1 + $0x38] sm:$0xff] (!%p139_p2)   ;;  %v2019_v40 = vld [vmem:[%s2138_s2] ss:$0 sm:$0xff] (!%p139_p2) }
   0x8   : > { %1772 = vmatprep.subr.bf16.mxu0 (!%p139_p2), %v1875_v1  ;;  %1851 = vmatprep.subr.bf16.mxu1 (!%p139_p2), %v1875_v1 }
   0xb   : > { %1773 = vmatpush3.bf16.msra.mxu0 (!%p139_p2), %v1875_v1  ;;  %1859 = vmatpush3.bf16.msra.mxu1 (!%p139_p2), %v1875_v1 }
   0xc   : > { %1774 = vmatprep.subr.bf16.mxu0 (!%p139_p2), %v1876_v2  ;;  %1852 = vmatprep.subr.bf16.mxu1 (!%p139_p2), %v1876_v2 }
   0xd   : > { %s2141_s16 = smov (!%p163_p3, %s1364_s16), 255 }
   0xe   : > { %s1365_s21 = sshll.u32 %s2141_s16, 2 }
   0xf   : > { %s1967_s24 = scalar_lea.vmem %s2136_s0, %s1365_s21  ;;  %1775 = vmatpush3.bf16.msra.mxu0 %v1876_v2  ;;  %1860 = vmatpush3.bf16.msra.mxu1 %v1876_v2  ;;  %s2036_s13 = scalar_lea.vmem %s2139_s3, %s1365_s21 }
  0x10   : > { %v1882_v4 = vld [vmem:[%s1967_s24] sm:$0xff]   ;;  %1776 = vmatprep.subr.bf16.mxu0 %v1877_v3  ;;  %1853 = vmatprep.subr.bf16.mxu1 %v1877_v3  ;;  %v1884_v10 = vld [vmem:[%s1967_s24 + $0x8] sm:$0xff]   ;;  %v1886_v12 = vld [vmem:[%s1967_s24 + $0x10] sm:$0xff]  }
  0x11   : > { %v1883_v5 = vld [vmem:[%s1967_s24 + $0x80] sm:$0xff]   ;;  %1786 = vmatprep.mubr.bf16.mxu0 %v1882_v4  ;;  %v1885_v11 = vld [vmem:[%s1967_s24 + $0x88] sm:$0xff]   ;;  %v1887_v13 = vld [vmem:[%s1967_s24 + $0x90] sm:$0xff]  }
  0x12   : > { %1818 = vmatprep.mubr.bf16.mxu1 %v1883_v5  ;;  %v1888_v14 = vld [vmem:[%s1967_s24 + $0x18] sm:$0xff]   ;;  %v1890_v16 = vld [vmem:[%s1967_s24 + $0x20] sm:$0xff]   ;;  %v1892_v18 = vld [vmem:[%s1967_s24 + $0x28] sm:$0xff]  }
  0x13   : > { %1777 = vmatpush3.bf16.msra.mxu0 %v1877_v3  ;;  %1861 = vmatpush3.bf16.msra.mxu1 %v1877_v3  ;;  %v1889_v15 = vld [vmem:[%s1967_s24 + $0x98] sm:$0xff]   ;;  %v1891_v17 = vld [vmem:[%s1967_s24 + $0xa0] sm:$0xff]   ;;  %v1893_v19 = vld [vmem:[%s1967_s24 + $0xa8] sm:$0xff]  }
  0x14   : > { %1778 = vmatprep.subr.bf16.mxu0 %v1878_v6  ;;  %1854 = vmatprep.subr.bf16.mxu1 %v1878_v6  ;;  %v1894_v20 = vld [vmem:[%s1967_s24 + $0x30] sm:$0xff]   ;;  %v1896_v22 = vld [vmem:[%s1967_s24 + $0x38] sm:$0xff]   ;;  %v1898_v24 = vld [vmem:[%s1967_s24 + $0x40] sm:$0xff]  }
  0x15   : > { %v1895_v21 = vld [vmem:[%s1967_s24 + $0xb0] sm:$0xff]   ;;  %v1897_v23 = vld [vmem:[%s1967_s24 + $0xb8] sm:$0xff]   ;;  %v1899_v25 = vld [vmem:[%s1967_s24 + $0xc0] sm:$0xff]  }
  0x16   : > { %v1900_v26 = vld [vmem:[%s1967_s24 + $0x48] sm:$0xff]   ;;  %v1902_v28 = vld [vmem:[%s1967_s24 + $0x50] sm:$0xff]   ;;  %v1904_v30 = vld [vmem:[%s1967_s24 + $0x58] sm:$0xff]  }
  0x17   : > { %1779 = vmatpush3.bf16.msra.mxu0 %v1878_v6  ;;  %1862 = vmatpush3.bf16.msra.mxu1 %v1878_v6  ;;  %v1901_v27 = vld [vmem:[%s1967_s24 + $0xc8] sm:$0xff]   ;;  %v1903_v29 = vld [vmem:[%s1967_s24 + $0xd0] sm:$0xff]   ;;  %v1905_v31 = vld [vmem:[%s1967_s24 + $0xd8] sm:$0xff]  }
  0x18   : > { %1780 = vmatprep.subr.bf16.mxu0 %v1879_v7  ;;  %1855 = vmatprep.subr.bf16.mxu1 %v1879_v7  ;;  %v1906_v32 = vld [vmem:[%s1967_s24 + $0x60] sm:$0xff]   ;;  %v1908_v34 = vld [vmem:[%s1967_s24 + $0x68] sm:$0xff]   ;;  %v1910_v36 = vld [vmem:[%s1967_s24 + $0x70] sm:$0xff]  }
  0x19   : > { %v1907_v33 = vld [vmem:[%s1967_s24 + $0xe0] sm:$0xff]   ;;  %v1909_v35 = vld [vmem:[%s1967_s24 + $0xe8] sm:$0xff]   ;;  %v1911_v37 = vld [vmem:[%s1967_s24 + $0xf0] sm:$0xff]  }
  0x1a   : > { %v1912_v38 = vld [vmem:[%s1967_s24 + $0x78] sm:$0xff]  }
  0x1b   : > { %1781 = vmatpush3.bf16.msra.mxu0 %v1879_v7  ;;  %1863 = vmatpush3.bf16.msra.mxu1 %v1879_v7  ;;  %v1913_v39 = vld [vmem:[%s1967_s24 + $0xf8] sm:$0xff]  }
  0x1c   : > { %1782 = vmatprep.subr.bf16.mxu0 %v1880_v8  ;;  %1856 = vmatprep.subr.bf16.mxu1 %v1880_v8 }
  0x1f   : > { %1783 = vmatpush3.bf16.msra.mxu0 %v1880_v8  ;;  %1864 = vmatpush3.bf16.msra.mxu1 %v1880_v8 }
  0x20   : > { %1784 = vmatprep.subr.bf16.mxu0 %v1881_v9  ;;  %1857 = vmatprep.subr.bf16.mxu1 %v1881_v9 }
  0x23   : > { %1785 = vmatpush3.bf16.msra.mxu0 %v1881_v9  ;;  %1865 = vmatpush3.bf16.msra.mxu1 %v1881_v9 }
  0x26   : > { %1787 = vmatmul.mubr.bf16.vlgmr.msra.gmra.mrb[0].mxu0 %v1884_v10  ;;  %1819 = vmatmul.mubr.bf16.vlgmr.msra.gmra.mrb[0].mxu1 %v1885_v11 }
  0x27   : > { %1790 = vmatprep.mubr.bf16.mxu0 %v1886_v12  ;;  %1822 = vmatprep.mubr.bf16.mxu1 %v1887_v13 }
  0x2e   : > { %1791 = vmatmul.mubr.bf16.gmra.mrb[4].mxu0 %v1888_v14  ;;  %1823 = vmatmul.mubr.bf16.gmra.mrb[4].mxu1 %v1889_v15 }
  0x2f   : > { %1794 = vmatprep.mubr.bf16.mxu0 %v1890_v16  ;;  %1826 = vmatprep.mubr.bf16.mxu1 %v1891_v17 }
  0x36   : > { %1795 = vmatmul.mubr.bf16.gmra.mrb[8].mxu0 %v1892_v18  ;;  %1827 = vmatmul.mubr.bf16.gmra.mrb[8].mxu1 %v1893_v19 }
  0x37   : > { %1798 = vmatprep.mubr.bf16.mxu0 %v1894_v20  ;;  %1830 = vmatprep.mubr.bf16.mxu1 %v1895_v21 }
  0x3e   : > { %1799 = vmatmul.mubr.bf16.gmra.mrb[12].mxu0 %v1896_v22  ;;  %1831 = vmatmul.mubr.bf16.gmra.mrb[12].mxu1 %v1897_v23 }
  0x3f   : > { %1802 = vmatprep.mubr.bf16.mxu0 %v1898_v24  ;;  %1834 = vmatprep.mubr.bf16.mxu1 %v1899_v25 }
  0x46   : > { %1803 = vmatmul.mubr.bf16.gmra.mrb[16].mxu0 %v1900_v26  ;;  %1835 = vmatmul.mubr.bf16.gmra.mrb[16].mxu1 %v1901_v27 }
  0x47   : > { %1806 = vmatprep.mubr.bf16.mxu0 %v1902_v28  ;;  %1838 = vmatprep.mubr.bf16.mxu1 %v1903_v29 }
  0x4e   : > { %1807 = vmatmul.mubr.bf16.gmra.mrb[20].mxu0 %v1904_v30  ;;  %1839 = vmatmul.mubr.bf16.gmra.mrb[20].mxu1 %v1905_v31 }
  0x4f   : > { %1810 = vmatprep.mubr.bf16.mxu0 %v1906_v32  ;;  %1842 = vmatprep.mubr.bf16.mxu1 %v1907_v33 }
  0x56   : > { %1811 = vmatmul.mubr.bf16.gmra.mrb[24].mxu0 %v1908_v34  ;;  %1843 = vmatmul.mubr.bf16.gmra.mrb[24].mxu1 %v1909_v35 }
  0x57   : > { %1814 = vmatprep.mubr.bf16.mxu0 %v1910_v36  ;;  %1846 = vmatprep.mubr.bf16.mxu1 %v1911_v37 }
  0x5e   : > { %1815 = vmatmul.mubr.bf16.gmra.mrb[28].mxu0 %v1912_v38  ;;  %1847 = vmatmul.mubr.bf16.gmra.mrb[28].mxu1 %v1913_v39 }
  0xf9   : > { %v1788_v41 = vpop.f32.mrb[0].mxu0  ;;  %v1820_v42 = vpop.f32.mrb[0].mxu1 }
  0xfa   : > { %v545_v43 = vadd.f32 %v1788_v41, %v2019_v40  ;;  %v673_v44 = vadd.f32 %v1820_v42, %v2019_v40  ;;  %v536_v45 = vpop.f32.mrb[1].mxu0  ;;  %v664_v46 = vpop.f32.mrb[1].mxu1 }
  0xfb   : > { %v537_v47 = vadd.f32 %v2019_v40, %v536_v45  ;;  %v665_v48 = vadd.f32 %v2019_v40, %v664_v46  ;;  %v1789_v49 = vpop.f32.mrb[2].mxu0  ;;  %v1821_v50 = vpop.f32.mrb[2].mxu1 }
  0xfc   : > { %vm793_vm0 = vcmp.ge.f32.partialorder %v545_v43, 0.0  ;;  %v857_v51 = vmul.f32 0.2, %v545_v43  ;;  %vm825_vm1 = vcmp.ge.f32.partialorder %v673_v44, 0.0  ;;  %v889_v52 = vmul.f32 0.2, %v673_v44 }
  0xfd   : > { %vm791_vm2 = vcmp.ge.f32.partialorder %v537_v47, 0.0  ;;  %v855_v53 = vmul.f32 0.2, %v537_v47  ;;  %vm823_vm3 = vcmp.ge.f32.partialorder %v665_v48, 0.0  ;;  %v887_v54 = vmul.f32 0.2, %v665_v48 }
  0xfe   : > { %v548_v55 = vadd.f32 %v1789_v49, %v2019_v40  ;;  %v676_v56 = vadd.f32 %v1821_v50, %v2019_v40  ;;  %v539_v57 = vpop.f32.mrb[3].mxu0  ;;  %v667_v58 = vpop.f32.mrb[3].mxu1  ;;  %v921_v59 = vsel %vm793_vm0, %v545_v43, %v857_v51  ;;  %v953_v60 = vsel %vm825_vm1, %v673_v44, %v889_v52 }
  0xff   : > { %v540_v61 = vadd.f32 %v2019_v40, %v539_v57  ;;  %v668_v62 = vadd.f32 %v2019_v40, %v667_v58  ;;  %v919_v3 = vsel %vm791_vm2, %v537_v47, %v855_v53  ;;  %v951_v4 = vsel %vm823_vm3, %v665_v48, %v887_v54 }
 0x100   : > { %vm794_vm4 = vcmp.ge.f32.partialorder %v548_v55, 0.0  ;;  %v858_v63 = vmul.f32 0.2, %v548_v55  ;;  %vm826_vm5 = vcmp.ge.f32.partialorder %v676_v56, 0.0  ;;  %v890_v0 = vmul.f32 0.2, %v676_v56 }
 0x101   : > { %vm792_vm6 = vcmp.ge.f32.partialorder %v540_v61, 0.0  ;;  %v856_v1 = vmul.f32 0.2, %v540_v61  ;;  %vm824_vm7 = vcmp.ge.f32.partialorder %v668_v62, 0.0  ;;  %v888_v2 = vmul.f32 0.2, %v668_v62 }
 0x102   : > { %v922_v5 = vsel %vm794_vm4, %v548_v55, %v858_v63  ;;  %v954_v6 = vsel %vm826_vm5, %v676_v56, %v890_v0  ;;  %v1792_v7 = vpop.f32.mrb[4].mxu0  ;;  %v1824_v8 = vpop.f32.mrb[4].mxu1 }
 0x103   : > { %v1547_v9 = vpack.c.bf16 %v922_v5, %v921_v59  ;;  %v1627_v10 = vpack.c.bf16 %v954_v6, %v953_v60  ;;  %v920_v11 = vsel %vm792_vm6, %v540_v61, %v856_v1  ;;  %v952_v12 = vsel %vm824_vm7, %v668_v62, %v888_v2  ;;  %v552_v13 = vpop.f32.mrb[5].mxu0  ;;  %v680_v14 = vpop.f32.mrb[5].mxu1 }
 0x104   : > { %v1542_v15 = vpack.c.bf16 %v920_v11, %v919_v3  ;;  %v1622_v16 = vpack.c.bf16 %v952_v12, %v951_v4  ;;  %v561_v17 = vadd.f32 %v1792_v7, %v2019_v40  ;;  %v689_v18 = vadd.f32 %v1824_v8, %v2019_v40  ;;  %v1793_v19 = vpop.f32.mrb[6].mxu0  ;;  %v1825_v20 = vpop.f32.mrb[6].mxu1 }
 0x105   : > { %1699 = vst [vmem:[%s2036_s13 + $0x8] sm:$0xff] %v1547_v9   ;;  %1715 = vst [vmem:[%s2036_s13 + $0x88] sm:$0xff] %v1627_v10   ;;  %v553_v21 = vadd.f32 %v2019_v40, %v552_v13  ;;  %v681_v22 = vadd.f32 %v2019_v40, %v680_v14  ;;  %v564_v23 = vadd.f32 %v1793_v19, %v2019_v40  ;;  %v555_v25 = vpop.f32.mrb[7].mxu0  ;;  %v683_v26 = vpop.f32.mrb[7].mxu1 }
 0x106   : > { %v692_v24 = vadd.f32 %v1825_v20, %v2019_v40  ;;  %1543 = vst [vmem:[%s2036_s13] sm:$0xff] %v1542_v15   ;;  %1714 = vst [vmem:[%s2036_s13 + $0x80] sm:$0xff] %v1622_v16   ;;  %vm797_vm8 = vcmp.ge.f32.partialorder %v561_v17, 0.0  ;;  %v861_v27 = vmul.f32 0.2, %v561_v17  ;;  %vm829_vm9 = vcmp.ge.f32.partialorder %v689_v18, 0.0 }
 0x107   : > { %v893_v28 = vmul.f32 0.2, %v689_v18  ;;  %vm795_vm10 = vcmp.ge.f32.partialorder %v553_v21, 0.0  ;;  %v859_v29 = vmul.f32 0.2, %v553_v21  ;;  %vm827_vm11 = vcmp.ge.f32.partialorder %v681_v22, 0.0 }
 0x108   : > { %v891_v30 = vmul.f32 0.2, %v681_v22  ;;  %v925_v31 = vsel %vm797_vm8, %v561_v17, %v861_v27  ;;  %vm798_vm12 = vcmp.ge.f32.partialorder %v564_v23, 0.0  ;;  %v862_v33 = vmul.f32 0.2, %v564_v23 }
 0x109   : > { %v957_v32 = vsel %vm829_vm9, %v689_v18, %v893_v28  ;;  %v923_v34 = vsel %vm795_vm10, %v553_v21, %v859_v29  ;;  %vm830_vm13 = vcmp.ge.f32.partialorder %v692_v24, 0.0  ;;  %v894_v36 = vmul.f32 0.2, %v692_v24  ;;  %v1796_v37 = vpop.f32.mrb[8].mxu0  ;;  %v1828_v38 = vpop.f32.mrb[8].mxu1 }
 0x10a   : > { %v955_v35 = vsel %vm827_vm11, %v681_v22, %v891_v30  ;;  %v926_v39 = vsel %vm798_vm12, %v564_v23, %v862_v33  ;;  %v556_v41 = vadd.f32 %v2019_v40, %v555_v25  ;;  %v684_v42 = vadd.f32 %v2019_v40, %v683_v26  ;;  %v568_v44 = vpop.f32.mrb[9].mxu0  ;;  %v696_v45 = vpop.f32.mrb[9].mxu1 }
 0x10b   : > { %v577_v43 = vadd.f32 %v1796_v37, %v2019_v40  ;;  %v1557_v46 = vpack.c.bf16 %v926_v39, %v925_v31  ;;  %v958_v47 = vsel %vm830_vm13, %v692_v24, %v894_v36  ;;  %v705_v48 = vadd.f32 %v1828_v38, %v2019_v40  ;;  %v1797_v50 = vpop.f32.mrb[10].mxu0  ;;  %v1829_v51 = vpop.f32.mrb[10].mxu1 }
 0x10c   : > { %v569_v49 = vadd.f32 %v2019_v40, %v568_v44  ;;  %v1637_v52 = vpack.c.bf16 %v958_v47, %v957_v32  ;;  %vm796_vm14 = vcmp.ge.f32.partialorder %v556_v41, 0.0  ;;  %v860_v53 = vmul.f32 0.2, %v556_v41  ;;  %v571_v54 = vpop.f32.mrb[11].mxu0  ;;  %v699_v55 = vpop.f32.mrb[11].mxu1 }
 0x10d   : > { %vm828_vm15 = vcmp.ge.f32.partialorder %v684_v42, 0.0  ;;  %1701 = vst [vmem:[%s2036_s13 + $0x18] sm:$0xff] %v1557_v46   ;;  %v892_v56 = vmul.f32 0.2, %v684_v42  ;;  %vm801_vm0 = vcmp.ge.f32.partialorder %v577_v43, 0.0  ;;  %vm833_vm1 = vcmp.ge.f32.partialorder %v705_v48, 0.0 }
 0x10e   : > { %v865_v57 = vmul.f32 0.2, %v577_v43  ;;  %1717 = vst [vmem:[%s2036_s13 + $0x98] sm:$0xff] %v1637_v52   ;;  %v924_v58 = vsel %vm796_vm14, %v556_v41, %v860_v53  ;;  %v897_v59 = vmul.f32 0.2, %v705_v48  ;;  %vm799_vm2 = vcmp.ge.f32.partialorder %v569_v49, 0.0 }
 0x10f   : > { %v863_v60 = vmul.f32 0.2, %v569_v49  ;;  %v1552_v61 = vpack.c.bf16 %v924_v58, %v923_v34  ;;  %v956_v62 = vsel %vm828_vm15, %v684_v42, %v892_v56  ;;  %v697_v0 = vadd.f32 %v2019_v40, %v696_v45 }
 0x110   : > { %v929_v63 = vsel %vm801_vm0, %v577_v43, %v865_v57  ;;  %v1632_v1 = vpack.c.bf16 %v956_v62, %v955_v35  ;;  %v961_v2 = vsel %vm833_vm1, %v705_v48, %v897_v59  ;;  %v580_v4 = vadd.f32 %v1797_v50, %v2019_v40 }
 0x111   : > { %v927_v3 = vsel %vm799_vm2, %v569_v49, %v863_v60  ;;  %1700 = vst [vmem:[%s2036_s13 + $0x10] sm:$0xff] %v1552_v61   ;;  %vm831_vm3 = vcmp.ge.f32.partialorder %v697_v0, 0.0  ;;  %v895_v5 = vmul.f32 0.2, %v697_v0  ;;  %v708_v6 = vadd.f32 %v1829_v51, %v2019_v40  ;;  %v1800_v8 = vpop.f32.mrb[12].mxu0  ;;  %v1832_v9 = vpop.f32.mrb[12].mxu1 }
 0x112   : > { %v572_v7 = vadd.f32 %v2019_v40, %v571_v54  ;;  %1716 = vst [vmem:[%s2036_s13 + $0x90] sm:$0xff] %v1632_v1   ;;  %vm802_vm4 = vcmp.ge.f32.partialorder %v580_v4, 0.0  ;;  %v866_v10 = vmul.f32 0.2, %v580_v4  ;;  %v700_v11 = vadd.f32 %v2019_v40, %v699_v55  ;;  %v584_v13 = vpop.f32.mrb[13].mxu0  ;;  %v712_v14 = vpop.f32.mrb[13].mxu1 }
 0x113   : > { %v593_v12 = vadd.f32 %v1800_v8, %v2019_v40  ;;  %v959_v15 = vsel %vm831_vm3, %v697_v0, %v895_v5  ;;  %vm834_vm5 = vcmp.ge.f32.partialorder %v708_v6, 0.0  ;;  %v898_v16 = vmul.f32 0.2, %v708_v6  ;;  %v1801_v17 = vpop.f32.mrb[14].mxu0  ;;  %v1833_v18 = vpop.f32.mrb[14].mxu1 }
 0x114   : > { %vm800_vm6 = vcmp.ge.f32.partialorder %v572_v7, 0.0  ;;  %v930_v19 = vsel %vm802_vm4, %v580_v4, %v866_v10  ;;  %v864_v20 = vmul.f32 0.2, %v572_v7  ;;  %vm832_vm7 = vcmp.ge.f32.partialorder %v700_v11, 0.0  ;;  %v587_v22 = vpop.f32.mrb[15].mxu0  ;;  %v715_v26 = vpop.f32.mrb[15].mxu1 }
 0x115   : > { %v896_v21 = vmul.f32 0.2, %v700_v11  ;;  %v1567_v23 = vpack.c.bf16 %v930_v19, %v929_v63  ;;  %v962_v24 = vsel %vm834_vm5, %v708_v6, %v898_v16  ;;  %vm805_vm8 = vcmp.ge.f32.partialorder %v593_v12, 0.0 }
 0x116   : > { %v869_v25 = vmul.f32 0.2, %v593_v12  ;;  %v1647_v27 = vpack.c.bf16 %v962_v24, %v961_v2  ;;  %v928_v28 = vsel %vm800_vm6, %v572_v7, %v864_v20  ;;  %v721_v30 = vadd.f32 %v1832_v9, %v2019_v40 }
 0x117   : > { %v960_v29 = vsel %vm832_vm7, %v700_v11, %v896_v21  ;;  %1703 = vst [vmem:[%s2036_s13 + $0x28] sm:$0xff] %v1567_v23   ;;  %v1562_v31 = vpack.c.bf16 %v928_v28, %v927_v3  ;;  %v585_v34 = vadd.f32 %v2019_v40, %v584_v13  ;;  %v713_v36 = vadd.f32 %v2019_v40, %v712_v14 }
 0x118   : > { %v1642_v32 = vpack.c.bf16 %v960_v29, %v959_v15  ;;  %v933_v33 = vsel %vm805_vm8, %v593_v12, %v869_v25  ;;  %1719 = vst [vmem:[%s2036_s13 + $0xa8] sm:$0xff] %v1647_v27   ;;  %vm837_vm9 = vcmp.ge.f32.partialorder %v721_v30, 0.0  ;;  %v901_v35 = vmul.f32 0.2, %v721_v30 }
 0x119   : > { %v596_v37 = vadd.f32 %v1801_v17, %v2019_v40  ;;  %1702 = vst [vmem:[%s2036_s13 + $0x20] sm:$0xff] %v1562_v31   ;;  %vm803_vm10 = vcmp.ge.f32.partialorder %v585_v34, 0.0  ;;  %v867_v38 = vmul.f32 0.2, %v585_v34  ;;  %v724_v39 = vadd.f32 %v1833_v18, %v2019_v40  ;;  %v1804_v42 = vpop.f32.mrb[16].mxu0  ;;  %v1836_v43 = vpop.f32.mrb[16].mxu1 }
 0x11a   : > { %1718 = vst [vmem:[%s2036_s13 + $0xa0] sm:$0xff] %v1642_v32   ;;  %v588_v41 = vadd.f32 %v2019_v40, %v587_v22  ;;  %v965_v44 = vsel %vm837_vm9, %v721_v30, %v901_v35  ;;  %vm835_vm11 = vcmp.ge.f32.partialorder %v713_v36, 0.0  ;;  %v899_v45 = vmul.f32 0.2, %v713_v36  ;;  %v600_v46 = vpop.f32.mrb[17].mxu0  ;;  %v728_v47 = vpop.f32.mrb[17].mxu1 }
 0x11b   : > { %vm806_vm12 = vcmp.ge.f32.partialorder %v596_v37, 0.0  ;;  %v931_v48 = vsel %vm803_vm10, %v585_v34, %v867_v38  ;;  %v870_v49 = vmul.f32 0.2, %v596_v37  ;;  %vm838_vm13 = vcmp.ge.f32.partialorder %v724_v39, 0.0  ;;  %v1805_v51 = vpop.f32.mrb[18].mxu0  ;;  %v1837_v55 = vpop.f32.mrb[18].mxu1 }
 0x11c   : > { %v902_v50 = vmul.f32 0.2, %v724_v39  ;;  %v963_v52 = vsel %vm835_vm11, %v713_v36, %v899_v45  ;;  %vm804_vm14 = vcmp.ge.f32.partialorder %v588_v41, 0.0  ;;  %v868_v53 = vmul.f32 0.2, %v588_v41  ;;  %v603_v56 = vpop.f32.mrb[19].mxu0 }
 0x11d   : > { %v716_v54 = vadd.f32 %v2019_v40, %v715_v26  ;;  %v934_v57 = vsel %vm806_vm12, %v596_v37, %v870_v49  ;;  %v609_v59 = vadd.f32 %v1804_v42, %v2019_v40  ;;  %v737_v60 = vadd.f32 %v1836_v43, %v2019_v40  ;;  %v731_v61 = vpop.f32.mrb[19].mxu1 }
 0x11e   : > { %v966_v58 = vsel %vm838_vm13, %v724_v39, %v902_v50  ;;  %v1577_v62 = vpack.c.bf16 %v934_v57, %v933_v33  ;;  %v932_v0 = vsel %vm804_vm14, %v588_v41, %v868_v53  ;;  %v601_v5 = vadd.f32 %v2019_v40, %v600_v46 }
 0x11f   : > { %v1657_v63 = vpack.c.bf16 %v966_v58, %v965_v44  ;;  %vm836_vm15 = vcmp.ge.f32.partialorder %v716_v54, 0.0  ;;  %v1572_v1 = vpack.c.bf16 %v932_v0, %v931_v48  ;;  %v900_v2 = vmul.f32 0.2, %v716_v54 }
 0x120   : > { %vm809_vm0 = vcmp.ge.f32.partialorder %v609_v59, 0.0  ;;  %v873_v3 = vmul.f32 0.2, %v609_v59  ;;  %1705 = vst [vmem:[%s2036_s13 + $0x38] sm:$0xff] %v1577_v62   ;;  %vm841_vm1 = vcmp.ge.f32.partialorder %v737_v60, 0.0  ;;  %v729_v6 = vadd.f32 %v2019_v40, %v728_v47 }
 0x121   : > { %1721 = vst [vmem:[%s2036_s13 + $0xb8] sm:$0xff] %v1657_v63   ;;  %v905_v4 = vmul.f32 0.2, %v737_v60  ;;  %1704 = vst [vmem:[%s2036_s13 + $0x30] sm:$0xff] %v1572_v1   ;;  %v964_v7 = vsel %vm836_vm15, %v716_v54, %v900_v2  ;;  %v612_v9 = vadd.f32 %v1805_v51, %v2019_v40  ;;  %v740_v10 = vadd.f32 %v1837_v55, %v2019_v40  ;;  %v1808_v11 = vpop.f32.mrb[20].mxu0  ;;  %v1840_v12 = vpop.f32.mrb[20].mxu1 }
 0x122   : > { %v937_v8 = vsel %vm809_vm0, %v609_v59, %v873_v3  ;;  %v1652_v13 = vpack.c.bf16 %v964_v7, %v963_v52  ;;  %vm807_vm2 = vcmp.ge.f32.partialorder %v601_v5, 0.0  ;;  %v871_v15 = vmul.f32 0.2, %v601_v5  ;;  %v616_v16 = vpop.f32.mrb[21].mxu0  ;;  %v744_v17 = vpop.f32.mrb[21].mxu1 }
 0x123   : > { %v969_v14 = vsel %vm841_vm1, %v737_v60, %v905_v4  ;;  %vm839_vm3 = vcmp.ge.f32.partialorder %v729_v6, 0.0  ;;  %v903_v18 = vmul.f32 0.2, %v729_v6  ;;  %vm810_vm4 = vcmp.ge.f32.partialorder %v612_v9, 0.0  ;;  %v1809_v23 = vpop.f32.mrb[22].mxu0  ;;  %v1841_v24 = vpop.f32.mrb[22].mxu1 }
 0x124   : > { %v874_v19 = vmul.f32 0.2, %v612_v9  ;;  %1720 = vst [vmem:[%s2036_s13 + $0xb0] sm:$0xff] %v1652_v13   ;;  %v935_v20 = vsel %vm807_vm2, %v601_v5, %v871_v15  ;;  %vm842_vm5 = vcmp.ge.f32.partialorder %v740_v10, 0.0  ;;  %v906_v21 = vmul.f32 0.2, %v740_v10 }
 0x125   : > { %v604_v22 = vadd.f32 %v2019_v40, %v603_v56  ;;  %v967_v25 = vsel %vm839_vm3, %v729_v6, %v903_v18  ;;  %v732_v27 = vadd.f32 %v2019_v40, %v731_v61  ;;  %v625_v28 = vadd.f32 %v1808_v11, %v2019_v40  ;;  %v619_v29 = vpop.f32.mrb[23].mxu0  ;;  %v747_v30 = vpop.f32.mrb[23].mxu1 }
 0x126   : > { %v938_v26 = vsel %vm810_vm4, %v612_v9, %v874_v19  ;;  %v970_v32 = vsel %vm842_vm5, %v740_v10, %v906_v21  ;;  %v753_v38 = vadd.f32 %v1840_v12, %v2019_v40  ;;  %v617_v39 = vadd.f32 %v2019_v40, %v616_v16 }
 0x127   : > { %v1587_v31 = vpack.c.bf16 %v938_v26, %v937_v8  ;;  %vm808_vm6 = vcmp.ge.f32.partialorder %v604_v22, 0.0  ;;  %v872_v33 = vmul.f32 0.2, %v604_v22  ;;  %v1667_v34 = vpack.c.bf16 %v970_v32, %v969_v14 }
 0x128   : > { %vm840_vm7 = vcmp.ge.f32.partialorder %v732_v27, 0.0  ;;  %v904_v35 = vmul.f32 0.2, %v732_v27  ;;  %vm813_vm8 = vcmp.ge.f32.partialorder %v625_v28, 0.0  ;;  %v877_v37 = vmul.f32 0.2, %v625_v28 }
 0x129   : > { %1707 = vst [vmem:[%s2036_s13 + $0x48] sm:$0xff] %v1587_v31   ;;  %v936_v36 = vsel %vm808_vm6, %v604_v22, %v872_v33  ;;  %1723 = vst [vmem:[%s2036_s13 + $0xc8] sm:$0xff] %v1667_v34   ;;  %v745_v43 = vadd.f32 %v2019_v40, %v744_v17  ;;  %v628_v44 = vadd.f32 %v1809_v23, %v2019_v40  ;;  %v1812_v45 = vpop.f32.mrb[24].mxu0  ;;  %v1844_v46 = vpop.f32.mrb[24].mxu1  ;;  %vm845_vm9 = vcmp.ge.f32.partialorder %v753_v38, 0.0 }
 0x12a   : > { %v1582_v41 = vpack.c.bf16 %v936_v36, %v935_v20  ;;  %v968_v42 = vsel %vm840_vm7, %v732_v27, %v904_v35  ;;  %v909_v48 = vmul.f32 0.2, %v753_v38  ;;  %v632_v49 = vpop.f32.mrb[25].mxu0  ;;  %v760_v50 = vpop.f32.mrb[25].mxu1  ;;  %v941_v51 = vsel %vm813_vm8, %v625_v28, %v877_v37 }
 0x12b   : > { %v1662_v47 = vpack.c.bf16 %v968_v42, %v967_v25  ;;  %vm811_vm10 = vcmp.ge.f32.partialorder %v617_v39, 0.0  ;;  %v875_v52 = vmul.f32 0.2, %v617_v39  ;;  %v907_v53 = vmul.f32 0.2, %v745_v43  ;;  %v1813_v56 = vpop.f32.mrb[26].mxu0 }
 0x12c   : > { %1706 = vst [vmem:[%s2036_s13 + $0x40] sm:$0xff] %v1582_v41   ;;  %vm843_vm11 = vcmp.ge.f32.partialorder %v745_v43, 0.0  ;;  %vm814_vm12 = vcmp.ge.f32.partialorder %v628_v44, 0.0  ;;  %v878_v54 = vmul.f32 0.2, %v628_v44  ;;  %v756_v55 = vadd.f32 %v1841_v24, %v2019_v40  ;;  %v1845_v57 = vpop.f32.mrb[26].mxu1 }
 0x12d   : > { %1722 = vst [vmem:[%s2036_s13 + $0xc0] sm:$0xff] %v1662_v47   ;;  %v973_v58 = vsel %vm845_vm9, %v753_v38, %v909_v48  ;;  %v939_v59 = vsel %vm811_vm10, %v617_v39, %v875_v52  ;;  %v620_v60 = vadd.f32 %v2019_v40, %v619_v29  ;;  %v748_v61 = vadd.f32 %v2019_v40, %v747_v30  ;;  %v635_v62 = vpop.f32.mrb[27].mxu0  ;;  %v763_v63 = vpop.f32.mrb[27].mxu1 }
 0x12e   : > { %v942_v0 = vsel %vm814_vm12, %v628_v44, %v878_v54  ;;  %vm846_vm13 = vcmp.ge.f32.partialorder %v756_v55, 0.0  ;;  %v910_v1 = vmul.f32 0.2, %v756_v55  ;;  %v641_v2 = vadd.f32 %v1812_v45, %v2019_v40 }
 0x12f   : > { %v1597_v3 = vpack.c.bf16 %v942_v0, %v941_v51  ;;  %vm812_vm14 = vcmp.ge.f32.partialorder %v620_v60, 0.0  ;;  %v876_v4 = vmul.f32 0.2, %v620_v60  ;;  %vm844_vm15 = vcmp.ge.f32.partialorder %v748_v61, 0.0 }
 0x130   : > { %v974_v5 = vsel %vm846_vm13, %v756_v55, %v910_v1  ;;  %v908_v6 = vmul.f32 0.2, %v748_v61  ;;  %vm817_vm0 = vcmp.ge.f32.partialorder %v641_v2, 0.0  ;;  %v881_v7 = vmul.f32 0.2, %v641_v2 }
 0x131   : > { %1709 = vst [vmem:[%s2036_s13 + $0x58] sm:$0xff] %v1597_v3   ;;  %v1677_v8 = vpack.c.bf16 %v974_v5, %v973_v58  ;;  %v940_v9 = vsel %vm812_vm14, %v620_v60, %v876_v4  ;;  %v769_v10 = vadd.f32 %v1844_v46, %v2019_v40  ;;  %v633_v11 = vadd.f32 %v2019_v40, %v632_v49  ;;  %v1816_v12 = vpop.f32.mrb[28].mxu0  ;;  %v1848_v13 = vpop.f32.mrb[28].mxu1 }
 0x132   : > { %v971_v14 = vsel %vm843_vm11, %v745_v43, %v907_v53  ;;  %v1592_v15 = vpack.c.bf16 %v940_v9, %v939_v59  ;;  %v972_v16 = vsel %vm844_vm15, %v748_v61, %v908_v6  ;;  %v761_v17 = vadd.f32 %v2019_v40, %v760_v50  ;;  %v648_v18 = vpop.f32.mrb[29].mxu0  ;;  %v776_v19 = vpop.f32.mrb[29].mxu1 }
 0x133   : > { %1725 = vst [vmem:[%s2036_s13 + $0xd8] sm:$0xff] %v1677_v8   ;;  %v1672_v20 = vpack.c.bf16 %v972_v16, %v971_v14  ;;  %vm849_vm1 = vcmp.ge.f32.partialorder %v769_v10, 0.0  ;;  %v913_v21 = vmul.f32 0.2, %v769_v10  ;;  %vm815_vm2 = vcmp.ge.f32.partialorder %v633_v11, 0.0  ;;  %v1817_v22 = vpop.f32.mrb[30].mxu0 }
 0x134   : > { %v1849_v23 = vpop.f32.mrb[30].mxu1  ;;  %1708 = vst [vmem:[%s2036_s13 + $0x50] sm:$0xff] %v1592_v15   ;;  %v945_v24 = vsel %vm817_vm0, %v641_v2, %v881_v7  ;;  %v879_v25 = vmul.f32 0.2, %v633_v11  ;;  %vm847_vm3 = vcmp.ge.f32.partialorder %v761_v17, 0.0  ;;  %v644_v26 = vadd.f32 %v1813_v56, %v2019_v40  ;;  %v651_v27 = vpop.f32.mrb[31].mxu0 }
 0x135   : > { %1724 = vst [vmem:[%s2036_s13 + $0xd0] sm:$0xff] %v1672_v20   ;;  %v911_v28 = vmul.f32 0.2, %v761_v17  ;;  %v772_v29 = vadd.f32 %v1845_v57, %v2019_v40  ;;  %v636_v30 = vadd.f32 %v2019_v40, %v635_v62  ;;  %v764_v31 = vadd.f32 %v2019_v40, %v763_v63  ;;  %v779_v32 = vpop.f32.mrb[31].mxu1 }
 0x136   : > { %v977_v33 = vsel %vm849_vm1, %v769_v10, %v913_v21  ;;  %v943_v34 = vsel %vm815_vm2, %v633_v11, %v879_v25  ;;  %vm818_vm4 = vcmp.ge.f32.partialorder %v644_v26, 0.0  ;;  %v882_v35 = vmul.f32 0.2, %v644_v26 }
 0x137   : > { %vm850_vm5 = vcmp.ge.f32.partialorder %v772_v29, 0.0  ;;  %v914_v36 = vmul.f32 0.2, %v772_v29  ;;  %vm816_vm6 = vcmp.ge.f32.partialorder %v636_v30, 0.0  ;;  %v880_v37 = vmul.f32 0.2, %v636_v30 }
 0x138   : > { %v946_v38 = vsel %vm818_vm4, %v644_v26, %v882_v35  ;;  %vm848_vm7 = vcmp.ge.f32.partialorder %v764_v31, 0.0  ;;  %v912_v39 = vmul.f32 0.2, %v764_v31  ;;  %v657_v41 = vadd.f32 %v1816_v12, %v2019_v40 }
 0x139   : > { %v1607_v42 = vpack.c.bf16 %v946_v38, %v945_v24  ;;  %v978_v43 = vsel %vm850_vm5, %v772_v29, %v914_v36  ;;  %v944_v44 = vsel %vm816_vm6, %v636_v30, %v880_v37  ;;  %v785_v45 = vadd.f32 %v1848_v13, %v2019_v40 }
 0x13a   : > { %v975_v46 = vsel %vm847_vm3, %v761_v17, %v911_v28  ;;  %v1687_v47 = vpack.c.bf16 %v978_v43, %v977_v33  ;;  %v1602_v48 = vpack.c.bf16 %v944_v44, %v943_v34  ;;  %v976_v49 = vsel %vm848_vm7, %v764_v31, %v912_v39 }
 0x13b   : > { %1711 = vst [vmem:[%s2036_s13 + $0x68] sm:$0xff] %v1607_v42   ;;  %v1682_v50 = vpack.c.bf16 %v976_v49, %v975_v46  ;;  %vm821_vm8 = vcmp.ge.f32.partialorder %v657_v41, 0.0  ;;  %v885_v51 = vmul.f32 0.2, %v657_v41  ;;  %v917_v52 = vmul.f32 0.2, %v785_v45 }
 0x13c   : > { %1727 = vst [vmem:[%s2036_s13 + $0xe8] sm:$0xff] %v1687_v47   ;;  %1710 = vst [vmem:[%s2036_s13 + $0x60] sm:$0xff] %v1602_v48   ;;  %v649_v53 = vadd.f32 %v2019_v40, %v648_v18  ;;  %v777_v54 = vadd.f32 %v2019_v40, %v776_v19  ;;  %v660_v55 = vadd.f32 %v1817_v22, %v2019_v40  ;;  %vm853_vm9 = vcmp.ge.f32.partialorder %v785_v45, 0.0 }
 0x13d   : > { %v788_v56 = vadd.f32 %v1849_v23, %v2019_v40  ;;  %1726 = vst [vmem:[%s2036_s13 + $0xe0] sm:$0xff] %v1682_v50   ;;  %v652_v57 = vadd.f32 %v2019_v40, %v651_v27  ;;  %v780_v58 = vadd.f32 %v2019_v40, %v779_v32  ;;  %v949_v59 = vsel %vm821_vm8, %v657_v41, %v885_v51 }
 0x13e   : > { %vm819_vm10 = vcmp.ge.f32.partialorder %v649_v53, 0.0  ;;  %v883_v60 = vmul.f32 0.2, %v649_v53  ;;  %v915_v61 = vmul.f32 0.2, %v777_v54  ;;  %vm822_vm11 = vcmp.ge.f32.partialorder %v660_v55, 0.0 }
 0x13f   : > { %v886_v62 = vmul.f32 0.2, %v660_v55  ;;  %vm854_vm12 = vcmp.ge.f32.partialorder %v788_v56, 0.0  ;;  %v918_v63 = vmul.f32 0.2, %v788_v56  ;;  %v981_v0 = vsel %vm853_vm9, %v785_v45, %v917_v52 }
 0x140   : > { %vm851_vm13 = vcmp.ge.f32.partialorder %v777_v54, 0.0  ;;  %vm820_vm14 = vcmp.ge.f32.partialorder %v652_v57, 0.0  ;;  %v884_v1 = vmul.f32 0.2, %v652_v57  ;;  %vm852_vm15 = vcmp.ge.f32.partialorder %v780_v58, 0.0 }
 0x141   : > { %v950_v2 = vsel %vm822_vm11, %v660_v55, %v886_v62  ;;  %v982_v3 = vsel %vm854_vm12, %v788_v56, %v918_v63  ;;  %v916_v40 = vmul.f32 0.2, %v780_v58  ;;  %v947_v4 = vsel %vm819_vm10, %v649_v53, %v883_v60 }
 0x142   : > { %v1617_v5 = vpack.c.bf16 %v950_v2, %v949_v59  ;;  %v1697_v6 = vpack.c.bf16 %v982_v3, %v981_v0  ;;  %v948_v7 = vsel %vm820_vm14, %v652_v57, %v884_v1  ;;  %v979_v8 = vsel %vm851_vm13, %v777_v54, %v915_v61 }
 0x143   : > { %v1612_v9 = vpack.c.bf16 %v948_v7, %v947_v4  ;;  %v980_v10 = vsel %vm852_vm15, %v780_v58, %v916_v40 }
 0x144   : > { %1713 = vst [vmem:[%s2036_s13 + $0x78] sm:$0xff] %v1617_v5   ;;  %1729 = vst [vmem:[%s2036_s13 + $0xf8] sm:$0xff] %v1697_v6   ;;  %v1692_v11 = vpack.c.bf16 %v980_v10, %v979_v8 }
 0x145   : > { %1712 = vst [vmem:[%s2036_s13 + $0x70] sm:$0xff] %v1612_v9  }
 0x146   : > { %1728 = vst [vmem:[%s2036_s13 + $0xf0] sm:$0xff] %v1692_v11  }
 0x147 PF: > { %s13_s12 = sadd.s32 1, %s1920_s12  }
 0x148   : > { %p10_p4 = scmp.ge.s32.totalorder %s13_s12, 6  }
 0x14a   :  { %12 = sbr.rel (!%p10_p4) target bundleno = 1 (0x1), region = 62 }

// kernel: forward.6
= control target key start
LH: loop header
LB: loop body
LE: loop exit
PB: predicated region body
PF: predicated region fallthrough
CT: control target
= control target key end

     0   :  { %s1190_s12 = smov 0   ;;  %s1317_s0 = inlined_call_operand.vmem [shape: bf16[512,128], index: 0, kind: input, shape index: {}]   ;;  %s1318_s1 = inlined_call_operand.vmem [shape: bf16[128,128], index: 1, kind: input, shape index: {}]   ;;  %s1319_s2 = inlined_call_operand.vmem [shape: f32[1,128], index: 2, kind: input, shape index: {}]   ;;  %s1320_s3 = inlined_call_operand.vmem [shape: bf16[512,128], index: 3, kind: output, shape index: {}]  }
   0x1 LB: > { %s847_s13 = sadd.s32 4294967295, %s1168_s12   ;;  %p851_p0 = scmp.ge.s32.totalorder %s1168_s12, 1  ;;  %s1168_s12 = sphi %s1190_s12, %s13_s12  }
   0x2   : > { %p138_p1 = scmp.lt.s32.totalorder %s1168_s12, 3 }
   0x4   : > { %p139_p2 = pnand %p851_p0, %p138_p1 }
   0x5   : > { %v1138_v0 = vld [vmem:[%s1318_s1] sm:$0xff] (!%p139_p2)   ;;  %s852_s16 = sshll.u32 (!%p139_p2), %s847_s13, 5  ;;  %v1139_v1 = vld [vmem:[%s1318_s1 + $0x8] sm:$0xff] (!%p139_p2)   ;;  %v1140_v2 = vld [vmem:[%s1318_s1 + $0x10] sm:$0xff] (!%p139_p2)  }
   0x6   : > { %142 = sbr.rel (%p139_p2) target bundleno = 293 (0x125), region = 32  ;;  %p163_p3 = scmp.lt.s32.totalorder (!%p139_p2), %s852_s16, 63  ;;  %1066 = vmatprep.subr.bf16.mxu0 (!%p139_p2), %v1138_v0  ;;  %1114 = vmatprep.subr.bf16.mxu1 (!%p139_p2), %v1138_v0  ;;  %v1141_v3 = vld [vmem:[%s1318_s1 + $0x18] sm:$0xff] (!%p139_p2)   ;;  %v1142_v6 = vld [vmem:[%s1318_s1 + $0x20] sm:$0xff] (!%p139_p2)   ;;  %v1143_v7 = vld [vmem:[%s1318_s1 + $0x28] sm:$0xff] (!%p139_p2)  }
   0x7   : > { %1067 = vmatpush3.bf16.msra.mxu0 (!%p139_p2), %v1138_v0  ;;  %1122 = vmatpush3.bf16.msra.mxu1 (!%p139_p2), %v1138_v0  ;;  %v1144_v8 = vld [vmem:[%s1318_s1 + $0x30] sm:$0xff] (!%p139_p2)   ;;  %v1145_v9 = vld [vmem:[%s1318_s1 + $0x38] sm:$0xff] (!%p139_p2)   ;;  %v1251_v24 = vld [vmem:[%s1319_s2] ss:$0 sm:$0xff] (!%p139_p2) }
   0x8   : > { %1068 = vmatprep.subr.bf16.mxu0 (!%p139_p2), %v1139_v1  ;;  %1115 = vmatprep.subr.bf16.mxu1 (!%p139_p2), %v1139_v1 }
   0xb   : > { %1069 = vmatpush3.bf16.msra.mxu0 (!%p139_p2), %v1139_v1  ;;  %1123 = vmatpush3.bf16.msra.mxu1 (!%p139_p2), %v1139_v1 }
   0xc   : > { %1070 = vmatprep.subr.bf16.mxu0 (!%p139_p2), %v1140_v2  ;;  %1116 = vmatprep.subr.bf16.mxu1 (!%p139_p2), %v1140_v2 }
   0xd   : > { %s1322_s16 = smov (!%p163_p3, %s852_s16), 63 }
   0xe   : > { %s853_s21 = sshll.u32 %s1322_s16, 2 }
   0xf   : > { %s1215_s24 = scalar_lea.vmem %s1317_s0, %s853_s21  ;;  %1071 = vmatpush3.bf16.msra.mxu0 %v1140_v2  ;;  %1124 = vmatpush3.bf16.msra.mxu1 %v1140_v2  ;;  %s1268_s13 = scalar_lea.vmem %s1320_s3, %s853_s21 }
  0x10   : > { %v1146_v4 = vld [vmem:[%s1215_s24] sm:$0xff]   ;;  %1072 = vmatprep.subr.bf16.mxu0 %v1141_v3  ;;  %1117 = vmatprep.subr.bf16.mxu1 %v1141_v3  ;;  %v1148_v10 = vld [vmem:[%s1215_s24 + $0x8] sm:$0xff]   ;;  %v1150_v12 = vld [vmem:[%s1215_s24 + $0x10] sm:$0xff]  }
  0x11   : > { %v1147_v5 = vld [vmem:[%s1215_s24 + $0x40] sm:$0xff]   ;;  %1082 = vmatprep.mubr.bf16.mxu0 %v1146_v4  ;;  %v1149_v11 = vld [vmem:[%s1215_s24 + $0x48] sm:$0xff]   ;;  %v1151_v13 = vld [vmem:[%s1215_s24 + $0x50] sm:$0xff]  }
  0x12   : > { %1098 = vmatprep.mubr.bf16.mxu1 %v1147_v5  ;;  %v1152_v14 = vld [vmem:[%s1215_s24 + $0x18] sm:$0xff]   ;;  %v1154_v16 = vld [vmem:[%s1215_s24 + $0x20] sm:$0xff]   ;;  %v1156_v18 = vld [vmem:[%s1215_s24 + $0x28] sm:$0xff]  }
  0x13   : > { %1073 = vmatpush3.bf16.msra.mxu0 %v1141_v3  ;;  %1125 = vmatpush3.bf16.msra.mxu1 %v1141_v3  ;;  %v1153_v15 = vld [vmem:[%s1215_s24 + $0x58] sm:$0xff]   ;;  %v1155_v17 = vld [vmem:[%s1215_s24 + $0x60] sm:$0xff]   ;;  %v1157_v19 = vld [vmem:[%s1215_s24 + $0x68] sm:$0xff]  }
  0x14   : > { %1074 = vmatprep.subr.bf16.mxu0 %v1142_v6  ;;  %1118 = vmatprep.subr.bf16.mxu1 %v1142_v6  ;;  %v1158_v20 = vld [vmem:[%s1215_s24 + $0x30] sm:$0xff]   ;;  %v1160_v22 = vld [vmem:[%s1215_s24 + $0x38] sm:$0xff]  }
  0x15   : > { %v1159_v21 = vld [vmem:[%s1215_s24 + $0x70] sm:$0xff]   ;;  %v1161_v23 = vld [vmem:[%s1215_s24 + $0x78] sm:$0xff]  }
  0x17   : > { %1075 = vmatpush3.bf16.msra.mxu0 %v1142_v6  ;;  %1126 = vmatpush3.bf16.msra.mxu1 %v1142_v6 }
  0x18   : > { %1076 = vmatprep.subr.bf16.mxu0 %v1143_v7  ;;  %1119 = vmatprep.subr.bf16.mxu1 %v1143_v7 }
  0x1b   : > { %1077 = vmatpush3.bf16.msra.mxu0 %v1143_v7  ;;  %1127 = vmatpush3.bf16.msra.mxu1 %v1143_v7 }
  0x1c   : > { %1078 = vmatprep.subr.bf16.mxu0 %v1144_v8  ;;  %1120 = vmatprep.subr.bf16.mxu1 %v1144_v8 }
  0x1f   : > { %1079 = vmatpush3.bf16.msra.mxu0 %v1144_v8  ;;  %1128 = vmatpush3.bf16.msra.mxu1 %v1144_v8 }
  0x20   : > { %1080 = vmatprep.subr.bf16.mxu0 %v1145_v9  ;;  %1121 = vmatprep.subr.bf16.mxu1 %v1145_v9 }
  0x23   : > { %1081 = vmatpush3.bf16.msra.mxu0 %v1145_v9  ;;  %1129 = vmatpush3.bf16.msra.mxu1 %v1145_v9 }
  0x26   : > { %1083 = vmatmul.mubr.bf16.vlgmr.msra.gmra.mrb[0].mxu0 %v1148_v10  ;;  %1099 = vmatmul.mubr.bf16.vlgmr.msra.gmra.mrb[0].mxu1 %v1149_v11 }
  0x27   : > { %1086 = vmatprep.mubr.bf16.mxu0 %v1150_v12  ;;  %1102 = vmatprep.mubr.bf16.mxu1 %v1151_v13 }
  0x2e   : > { %1087 = vmatmul.mubr.bf16.gmra.mrb[4].mxu0 %v1152_v14  ;;  %1103 = vmatmul.mubr.bf16.gmra.mrb[4].mxu1 %v1153_v15 }
  0x2f   : > { %1090 = vmatprep.mubr.bf16.mxu0 %v1154_v16  ;;  %1106 = vmatprep.mubr.bf16.mxu1 %v1155_v17 }
  0x36   : > { %1091 = vmatmul.mubr.bf16.gmra.mrb[8].mxu0 %v1156_v18  ;;  %1107 = vmatmul.mubr.bf16.gmra.mrb[8].mxu1 %v1157_v19 }
  0x37   : > { %1094 = vmatprep.mubr.bf16.mxu0 %v1158_v20  ;;  %1110 = vmatprep.mubr.bf16.mxu1 %v1159_v21 }
  0x3e   : > { %1095 = vmatmul.mubr.bf16.gmra.mrb[12].mxu0 %v1160_v22  ;;  %1111 = vmatmul.mubr.bf16.gmra.mrb[12].mxu1 %v1161_v23 }
  0xf9   : > { %v1084_v25 = vpop.f32.mrb[0].mxu0  ;;  %v1100_v26 = vpop.f32.mrb[0].mxu1 }
  0xfa   : > { %v417_v27 = vadd.f32 %v1084_v25, %v1251_v24  ;;  %v481_v28 = vadd.f32 %v1100_v26, %v1251_v24  ;;  %v408_v29 = vpop.f32.mrb[1].mxu0  ;;  %v472_v30 = vpop.f32.mrb[1].mxu1 }
  0xfb   : > { %v409_v31 = vadd.f32 %v1251_v24, %v408_v29  ;;  %v473_v32 = vadd.f32 %v1251_v24, %v472_v30  ;;  %v1085_v33 = vpop.f32.mrb[2].mxu0  ;;  %v1101_v34 = vpop.f32.mrb[2].mxu1 }
  0xfc   : > { %vm537_vm0 = vcmp.ge.f32.partialorder %v417_v27, 0.0  ;;  %v569_v35 = vmul.f32 0.2, %v417_v27  ;;  %vm553_vm1 = vcmp.ge.f32.partialorder %v481_v28, 0.0  ;;  %v585_v36 = vmul.f32 0.2, %v481_v28 }
  0xfd   : > { %vm535_vm2 = vcmp.ge.f32.partialorder %v409_v31, 0.0  ;;  %v567_v37 = vmul.f32 0.2, %v409_v31  ;;  %vm551_vm3 = vcmp.ge.f32.partialorder %v473_v32, 0.0  ;;  %v583_v38 = vmul.f32 0.2, %v473_v32 }
  0xfe   : > { %v420_v39 = vadd.f32 %v1085_v33, %v1251_v24  ;;  %v484_v40 = vadd.f32 %v1101_v34, %v1251_v24  ;;  %v411_v41 = vpop.f32.mrb[3].mxu0  ;;  %v475_v42 = vpop.f32.mrb[3].mxu1  ;;  %v601_v43 = vsel %vm537_vm0, %v417_v27, %v569_v35  ;;  %v617_v44 = vsel %vm553_vm1, %v481_v28, %v585_v36 }
  0xff   : > { %v412_v45 = vadd.f32 %v1251_v24, %v411_v41  ;;  %v476_v46 = vadd.f32 %v1251_v24, %v475_v42  ;;  %v599_v51 = vsel %vm535_vm2, %v409_v31, %v567_v37  ;;  %v615_v52 = vsel %vm551_vm3, %v473_v32, %v583_v38 }
 0x100   : > { %vm538_vm4 = vcmp.ge.f32.partialorder %v420_v39, 0.0  ;;  %v570_v47 = vmul.f32 0.2, %v420_v39  ;;  %vm554_vm5 = vcmp.ge.f32.partialorder %v484_v40, 0.0  ;;  %v586_v48 = vmul.f32 0.2, %v484_v40 }
 0x101   : > { %vm536_vm6 = vcmp.ge.f32.partialorder %v412_v45, 0.0  ;;  %v568_v49 = vmul.f32 0.2, %v412_v45  ;;  %vm552_vm7 = vcmp.ge.f32.partialorder %v476_v46, 0.0  ;;  %v584_v50 = vmul.f32 0.2, %v476_v46 }
 0x102   : > { %v602_v53 = vsel %vm538_vm4, %v420_v39, %v570_v47  ;;  %v618_v54 = vsel %vm554_vm5, %v484_v40, %v586_v48  ;;  %v1088_v55 = vpop.f32.mrb[4].mxu0  ;;  %v1104_v56 = vpop.f32.mrb[4].mxu1 }
 0x103   : > { %v955_v57 = vpack.c.bf16 %v602_v53, %v601_v43  ;;  %v995_v58 = vpack.c.bf16 %v618_v54, %v617_v44  ;;  %v600_v59 = vsel %vm536_vm6, %v412_v45, %v568_v49  ;;  %v616_v60 = vsel %vm552_vm7, %v476_v46, %v584_v50  ;;  %v424_v61 = vpop.f32.mrb[5].mxu0  ;;  %v488_v62 = vpop.f32.mrb[5].mxu1 }
 0x104   : > { %v950_v63 = vpack.c.bf16 %v600_v59, %v599_v51  ;;  %v990_v0 = vpack.c.bf16 %v616_v60, %v615_v52  ;;  %v433_v1 = vadd.f32 %v1088_v55, %v1251_v24  ;;  %v497_v2 = vadd.f32 %v1104_v56, %v1251_v24  ;;  %v1089_v3 = vpop.f32.mrb[6].mxu0  ;;  %v1105_v4 = vpop.f32.mrb[6].mxu1 }
 0x105   : > { %1027 = vst [vmem:[%s1268_s13 + $0x8] sm:$0xff] %v955_v57   ;;  %1035 = vst [vmem:[%s1268_s13 + $0x48] sm:$0xff] %v995_v58   ;;  %v425_v5 = vadd.f32 %v1251_v24, %v424_v61  ;;  %v489_v6 = vadd.f32 %v1251_v24, %v488_v62  ;;  %v436_v7 = vadd.f32 %v1089_v3, %v1251_v24  ;;  %v427_v9 = vpop.f32.mrb[7].mxu0  ;;  %v491_v10 = vpop.f32.mrb[7].mxu1 }
 0x106   : > { %v500_v8 = vadd.f32 %v1105_v4, %v1251_v24  ;;  %951 = vst [vmem:[%s1268_s13] sm:$0xff] %v950_v63   ;;  %1034 = vst [vmem:[%s1268_s13 + $0x40] sm:$0xff] %v990_v0   ;;  %vm541_vm8 = vcmp.ge.f32.partialorder %v433_v1, 0.0  ;;  %v573_v11 = vmul.f32 0.2, %v433_v1  ;;  %vm557_vm9 = vcmp.ge.f32.partialorder %v497_v2, 0.0 }
 0x107   : > { %v589_v12 = vmul.f32 0.2, %v497_v2  ;;  %vm539_vm10 = vcmp.ge.f32.partialorder %v425_v5, 0.0  ;;  %v571_v13 = vmul.f32 0.2, %v425_v5  ;;  %vm555_vm11 = vcmp.ge.f32.partialorder %v489_v6, 0.0 }
 0x108   : > { %v605_v14 = vsel %vm541_vm8, %v433_v1, %v573_v11  ;;  %v587_v15 = vmul.f32 0.2, %v489_v6  ;;  %vm542_vm12 = vcmp.ge.f32.partialorder %v436_v7, 0.0  ;;  %v574_v16 = vmul.f32 0.2, %v436_v7 }
 0x109   : > { %v621_v17 = vsel %vm557_vm9, %v497_v2, %v589_v12  ;;  %v603_v18 = vsel %vm539_vm10, %v425_v5, %v571_v13  ;;  %vm558_vm13 = vcmp.ge.f32.partialorder %v500_v8, 0.0  ;;  %v590_v19 = vmul.f32 0.2, %v500_v8  ;;  %v1092_v20 = vpop.f32.mrb[8].mxu0  ;;  %v1108_v21 = vpop.f32.mrb[8].mxu1 }
 0x10a   : > { %v606_v22 = vsel %vm542_vm12, %v436_v7, %v574_v16  ;;  %v428_v23 = vadd.f32 %v1251_v24, %v427_v9  ;;  %v492_v25 = vadd.f32 %v1251_v24, %v491_v10  ;;  %v449_v26 = vadd.f32 %v1092_v20, %v1251_v24  ;;  %v440_v27 = vpop.f32.mrb[9].mxu0  ;;  %v504_v28 = vpop.f32.mrb[9].mxu1 }
 0x10b   : > { %v965_v29 = vpack.c.bf16 %v606_v22, %v605_v14  ;;  %v622_v30 = vsel %vm558_vm13, %v500_v8, %v590_v19  ;;  %v513_v31 = vadd.f32 %v1108_v21, %v1251_v24  ;;  %v441_v32 = vadd.f32 %v1251_v24, %v440_v27  ;;  %v1093_v33 = vpop.f32.mrb[10].mxu0  ;;  %v1109_v34 = vpop.f32.mrb[10].mxu1 }
 0x10c   : > { %v1005_v35 = vpack.c.bf16 %v622_v30, %v621_v17  ;;  %vm540_vm14 = vcmp.ge.f32.partialorder %v428_v23, 0.0  ;;  %v572_v36 = vmul.f32 0.2, %v428_v23  ;;  %vm556_vm15 = vcmp.ge.f32.partialorder %v492_v25, 0.0  ;;  %v443_v37 = vpop.f32.mrb[11].mxu0  ;;  %v507_v38 = vpop.f32.mrb[11].mxu1 }
 0x10d   : > { %1029 = vst [vmem:[%s1268_s13 + $0x18] sm:$0xff] %v965_v29   ;;  %v588_v39 = vmul.f32 0.2, %v492_v25  ;;  %vm545_vm0 = vcmp.ge.f32.partialorder %v449_v26, 0.0  ;;  %v577_v40 = vmul.f32 0.2, %v449_v26  ;;  %v619_v41 = vsel %vm555_vm11, %v489_v6, %v587_v15 }
 0x10e   : > { %vm561_vm1 = vcmp.ge.f32.partialorder %v513_v31, 0.0  ;;  %1037 = vst [vmem:[%s1268_s13 + $0x58] sm:$0xff] %v1005_v35   ;;  %v604_v42 = vsel %vm540_vm14, %v428_v23, %v572_v36  ;;  %v593_v43 = vmul.f32 0.2, %v513_v31  ;;  %vm543_vm2 = vcmp.ge.f32.partialorder %v441_v32, 0.0 }
 0x10f   : > { %v960_v44 = vpack.c.bf16 %v604_v42, %v603_v18  ;;  %v620_v45 = vsel %vm556_vm15, %v492_v25, %v588_v39  ;;  %v575_v46 = vmul.f32 0.2, %v441_v32  ;;  %v505_v47 = vadd.f32 %v1251_v24, %v504_v28 }
 0x110   : > { %v1000_v48 = vpack.c.bf16 %v620_v45, %v619_v41  ;;  %v609_v49 = vsel %vm545_vm0, %v449_v26, %v577_v40  ;;  %v625_v50 = vsel %vm561_vm1, %v513_v31, %v593_v43  ;;  %v452_v51 = vadd.f32 %v1093_v33, %v1251_v24 }
 0x111   : > { %1028 = vst [vmem:[%s1268_s13 + $0x10] sm:$0xff] %v960_v44   ;;  %vm559_vm3 = vcmp.ge.f32.partialorder %v505_v47, 0.0  ;;  %v591_v52 = vmul.f32 0.2, %v505_v47  ;;  %v516_v53 = vadd.f32 %v1109_v34, %v1251_v24  ;;  %v444_v54 = vadd.f32 %v1251_v24, %v443_v37  ;;  %v1096_v55 = vpop.f32.mrb[12].mxu0  ;;  %v1112_v56 = vpop.f32.mrb[12].mxu1 }
 0x112   : > { %1036 = vst [vmem:[%s1268_s13 + $0x50] sm:$0xff] %v1000_v48   ;;  %vm546_vm4 = vcmp.ge.f32.partialorder %v452_v51, 0.0  ;;  %v578_v57 = vmul.f32 0.2, %v452_v51  ;;  %v508_v58 = vadd.f32 %v1251_v24, %v507_v38  ;;  %v465_v59 = vadd.f32 %v1096_v55, %v1251_v24  ;;  %v456_v60 = vpop.f32.mrb[13].mxu0  ;;  %v520_v61 = vpop.f32.mrb[13].mxu1 }
 0x113   : > { %v607_v62 = vsel %vm543_vm2, %v441_v32, %v575_v46  ;;  %vm562_vm5 = vcmp.ge.f32.partialorder %v516_v53, 0.0  ;;  %v594_v63 = vmul.f32 0.2, %v516_v53  ;;  %vm544_vm6 = vcmp.ge.f32.partialorder %v444_v54, 0.0  ;;  %v1097_v0 = vpop.f32.mrb[14].mxu0  ;;  %v1113_v1 = vpop.f32.mrb[14].mxu1 }
 0x114   : > { %v610_v2 = vsel %vm546_vm4, %v452_v51, %v578_v57  ;;  %v576_v3 = vmul.f32 0.2, %v444_v54  ;;  %vm560_vm7 = vcmp.ge.f32.partialorder %v508_v58, 0.0  ;;  %v592_v4 = vmul.f32 0.2, %v508_v58  ;;  %v459_v5 = vpop.f32.mrb[15].mxu0 }
 0x115   : > { %v623_v6 = vsel %vm559_vm3, %v505_v47, %v591_v52  ;;  %v975_v7 = vpack.c.bf16 %v610_v2, %v609_v49  ;;  %v626_v8 = vsel %vm562_vm5, %v516_v53, %v594_v63  ;;  %v581_v9 = vmul.f32 0.2, %v465_v59  ;;  %v523_v10 = vpop.f32.mrb[15].mxu1 }
 0x116   : > { %v1015_v11 = vpack.c.bf16 %v626_v8, %v625_v50  ;;  %v608_v12 = vsel %vm544_vm6, %v444_v54, %v576_v3  ;;  %v624_v13 = vsel %vm560_vm7, %v508_v58, %v592_v4  ;;  %v529_v14 = vadd.f32 %v1112_v56, %v1251_v24 }
 0x117   : > { %1031 = vst [vmem:[%s1268_s13 + $0x28] sm:$0xff] %v975_v7   ;;  %v970_v15 = vpack.c.bf16 %v608_v12, %v607_v62  ;;  %v1010_v16 = vpack.c.bf16 %v624_v13, %v623_v6  ;;  %vm549_vm8 = vcmp.ge.f32.partialorder %v465_v59, 0.0  ;;  %v457_v17 = vadd.f32 %v1251_v24, %v456_v60 }
 0x118   : > { %1039 = vst [vmem:[%s1268_s13 + $0x68] sm:$0xff] %v1015_v11   ;;  %vm565_vm9 = vcmp.ge.f32.partialorder %v529_v14, 0.0  ;;  %v597_v18 = vmul.f32 0.2, %v529_v14  ;;  %v521_v19 = vadd.f32 %v1251_v24, %v520_v61  ;;  %v468_v20 = vadd.f32 %v1097_v0, %v1251_v24 }
 0x119   : > { %1030 = vst [vmem:[%s1268_s13 + $0x20] sm:$0xff] %v970_v15   ;;  %1038 = vst [vmem:[%s1268_s13 + $0x60] sm:$0xff] %v1010_v16   ;;  %v579_v21 = vmul.f32 0.2, %v457_v17  ;;  %v532_v22 = vadd.f32 %v1113_v1, %v1251_v24  ;;  %v460_v23 = vadd.f32 %v1251_v24, %v459_v5  ;;  %v613_v25 = vsel %vm549_vm8, %v465_v59, %v581_v9 }
 0x11a   : > { %vm547_vm10 = vcmp.ge.f32.partialorder %v457_v17, 0.0  ;;  %vm550_vm11 = vcmp.ge.f32.partialorder %v468_v20, 0.0  ;;  %v629_v26 = vsel %vm565_vm9, %v529_v14, %v597_v18  ;;  %v582_v27 = vmul.f32 0.2, %v468_v20 }
 0x11b   : > { %vm566_vm12 = vcmp.ge.f32.partialorder %v532_v22, 0.0  ;;  %v598_v28 = vmul.f32 0.2, %v532_v22  ;;  %vm563_vm13 = vcmp.ge.f32.partialorder %v521_v19, 0.0  ;;  %vm548_vm14 = vcmp.ge.f32.partialorder %v460_v23, 0.0 }
 0x11c   : > { %v580_v29 = vmul.f32 0.2, %v460_v23  ;;  %v524_v30 = vadd.f32 %v1251_v24, %v523_v10  ;;  %v611_v31 = vsel %vm547_vm10, %v457_v17, %v579_v21  ;;  %v595_v32 = vmul.f32 0.2, %v521_v19 }
 0x11d   : > { %v614_v33 = vsel %vm550_vm11, %v468_v20, %v582_v27  ;;  %v630_v34 = vsel %vm566_vm12, %v532_v22, %v598_v28 }
 0x11e   : > { %v985_v35 = vpack.c.bf16 %v614_v33, %v613_v25  ;;  %v1025_v36 = vpack.c.bf16 %v630_v34, %v629_v26  ;;  %v612_v37 = vsel %vm548_vm14, %v460_v23, %v580_v29  ;;  %vm564_vm15 = vcmp.ge.f32.partialorder %v524_v30, 0.0 }
 0x11f   : > { %v980_v38 = vpack.c.bf16 %v612_v37, %v611_v31  ;;  %v596_v39 = vmul.f32 0.2, %v524_v30  ;;  %v627_v40 = vsel %vm563_vm13, %v521_v19, %v595_v32 }
 0x120   : > { %1033 = vst [vmem:[%s1268_s13 + $0x38] sm:$0xff] %v985_v35   ;;  %1041 = vst [vmem:[%s1268_s13 + $0x78] sm:$0xff] %v1025_v36  }
 0x121   : > { %1032 = vst [vmem:[%s1268_s13 + $0x30] sm:$0xff] %v980_v38   ;;  %v628_v41 = vsel %vm564_vm15, %v524_v30, %v596_v39 }
 0x122   : > { %v1020_v42 = vpack.c.bf16 %v628_v41, %v627_v40 }
 0x124   : > { %1040 = vst [vmem:[%s1268_s13 + $0x70] sm:$0xff] %v1020_v42  }
 0x125 PF: > { %s13_s12 = sadd.s32 1, %s1168_s12  }
 0x126   : > { %p10_p4 = scmp.ge.s32.totalorder %s13_s12, 4  }
 0x128   :  { %12 = sbr.rel (!%p10_p4) target bundleno = 1 (0x1), region = 62 }

// kernel: forward.7
= control target key start
LH: loop header
LB: loop body
LE: loop exit
PB: predicated region body
PF: predicated region fallthrough
CT: control target
= control target key end

     0   :  { %s868_s1 = inlined_call_operand.vmem [shape: bf16[256,128], index: 1, kind: input, shape index: {}]   ;;  %s869_s0 = inlined_call_operand.vmem [shape: bf16[128,256], index: 0, kind: input, shape index: {}]   ;;  %s870_s2 = inlined_call_operand.vmem [shape: f32[1,128], index: 2, kind: input, shape index: {}]   ;;  %s871_s3 = inlined_call_operand.vmem [shape: bf16[128,128], index: 3, kind: output, shape index: {}]  }
   0x1   :  { %v667_v0 = vld [vmem:[%s868_s1 + $0x40] sm:$0xff]   ;;  %v669_v2 = vld [vmem:[%s868_s1 + $0x48] sm:$0xff]   ;;  %v671_v4 = vld [vmem:[%s868_s1 + $0x50] sm:$0xff]  }
   0x2   :  { %v668_v1 = vld [vmem:[%s868_s1] sm:$0xff]   ;;  %587 = vmatprep.subr.bf16.mxu0 %v667_v0  ;;  %651 = vmatprep.subr.bf16.mxu1 %v667_v0  ;;  %v670_v3 = vld [vmem:[%s868_s1 + $0x8] sm:$0xff]   ;;  %v672_v5 = vld [vmem:[%s868_s1 + $0x10] sm:$0xff]  }
   0x3   :  { %588 = vmatpush3.bf16.msra.mxu0 %v668_v1  ;;  %659 = vmatpush3.bf16.msra.mxu1 %v668_v1  ;;  %v673_v6 = vld [vmem:[%s868_s1 + $0x58] sm:$0xff]   ;;  %v675_v8 = vld [vmem:[%s868_s1 + $0x60] sm:$0xff]   ;;  %v677_v10 = vld [vmem:[%s868_s1 + $0x68] sm:$0xff]  }
   0x4   :  { %589 = vmatprep.subr.bf16.mxu0 %v669_v2  ;;  %652 = vmatprep.subr.bf16.mxu1 %v669_v2  ;;  %v674_v7 = vld [vmem:[%s868_s1 + $0x18] sm:$0xff]   ;;  %v676_v9 = vld [vmem:[%s868_s1 + $0x20] sm:$0xff]   ;;  %v678_v13 = vld [vmem:[%s868_s1 + $0x28] sm:$0xff]  }
   0x5   :  { %v685_v11 = vld [vmem:[%s869_s0 + $0x4] ss:$8 sps:$4 sm:$0xff]   ;;  %v679_v14 = vld [vmem:[%s868_s1 + $0x70] sm:$0xff]   ;;  %v681_v16 = vld [vmem:[%s868_s1 + $0x78] sm:$0xff]  }
   0x6   :  { %v688_v12 = vld [vmem:[%s869_s0 + $0x44] ss:$8 sps:$4 sm:$0xff]   ;;  %278 = vmatprep.mubr.bf16.mxu0 %v685_v11  ;;  %v680_v15 = vld [vmem:[%s868_s1 + $0x30] sm:$0xff]   ;;  %v682_v17 = vld [vmem:[%s868_s1 + $0x38] sm:$0xff]  }
   0x7   :  { %590 = vmatpush3.bf16.msra.mxu0 %v670_v3  ;;  %660 = vmatpush3.bf16.msra.mxu1 %v670_v3  ;;  %v683_v18 = vld [vmem:[%s869_s0] ss:$8 sps:$4 sm:$0xff]   ;;  %v689_v20 = vld [vmem:[%s869_s0 + $0x14] ss:$8 sps:$4 sm:$0xff]   ;;  %v693_v22 = vld [vmem:[%s869_s0 + $0x10] ss:$8 sps:$4 sm:$0xff]  }
   0x8   :  { %591 = vmatprep.subr.bf16.mxu0 %v671_v4  ;;  %653 = vmatprep.subr.bf16.mxu1 %v671_v4  ;;  %v686_v19 = vld [vmem:[%s869_s0 + $0x40] ss:$8 sps:$4 sm:$0xff]   ;;  %v691_v21 = vld [vmem:[%s869_s0 + $0x54] ss:$8 sps:$4 sm:$0xff]   ;;  %v694_v23 = vld [vmem:[%s869_s0 + $0x50] ss:$8 sps:$4 sm:$0xff]  }
   0x9   :  { %310 = vmatprep.mubr.bf16.mxu1 %v688_v12  ;;  %v695_v24 = vld [vmem:[%s869_s0 + $0x24] ss:$8 sps:$4 sm:$0xff]   ;;  %v699_v26 = vld [vmem:[%s869_s0 + $0x20] ss:$8 sps:$4 sm:$0xff]   ;;  %v701_v28 = vld [vmem:[%s869_s0 + $0x34] ss:$8 sps:$4 sm:$0xff]  }
   0xa   :  { %v697_v25 = vld [vmem:[%s869_s0 + $0x64] ss:$8 sps:$4 sm:$0xff]   ;;  %v700_v27 = vld [vmem:[%s869_s0 + $0x60] ss:$8 sps:$4 sm:$0xff]   ;;  %v703_v29 = vld [vmem:[%s869_s0 + $0x74] ss:$8 sps:$4 sm:$0xff]  }
   0xb   :  { %592 = vmatpush3.bf16.msra.mxu0 %v672_v5  ;;  %661 = vmatpush3.bf16.msra.mxu1 %v672_v5  ;;  %v705_v30 = vld [vmem:[%s869_s0 + $0x30] ss:$8 sps:$4 sm:$0xff]   ;;  %v826_v34 = vld [vmem:[%s870_s2] ss:$0 sm:$0xff] }
   0xc   :  { %593 = vmatprep.subr.bf16.mxu0 %v673_v6  ;;  %654 = vmatprep.subr.bf16.mxu1 %v673_v6  ;;  %v706_v31 = vld [vmem:[%s869_s0 + $0x70] ss:$8 sps:$4 sm:$0xff]  }
   0xf   :  { %594 = vmatpush3.bf16.msra.mxu0 %v674_v7  ;;  %662 = vmatpush3.bf16.msra.mxu1 %v674_v7 }
  0x10   :  { %595 = vmatprep.subr.bf16.mxu0 %v675_v8  ;;  %655 = vmatprep.subr.bf16.mxu1 %v675_v8 }
  0x13   :  { %596 = vmatpush3.bf16.msra.mxu0 %v676_v9  ;;  %663 = vmatpush3.bf16.msra.mxu1 %v676_v9 }
  0x14   :  { %597 = vmatprep.subr.bf16.mxu0 %v677_v10  ;;  %656 = vmatprep.subr.bf16.mxu1 %v677_v10 }
  0x17   :  { %598 = vmatpush3.bf16.msra.mxu0 %v678_v13  ;;  %664 = vmatpush3.bf16.msra.mxu1 %v678_v13 }
  0x18   :  { %599 = vmatprep.subr.bf16.mxu0 %v679_v14  ;;  %657 = vmatprep.subr.bf16.mxu1 %v679_v14 }
  0x1b   :  { %600 = vmatpush3.bf16.msra.mxu0 %v680_v15  ;;  %665 = vmatpush3.bf16.msra.mxu1 %v680_v15 }
  0x1c   :  { %601 = vmatprep.subr.bf16.mxu0 %v681_v16  ;;  %658 = vmatprep.subr.bf16.mxu1 %v681_v16 }
  0x1f   :  { %602 = vmatpush3.bf16.msra.mxu0 %v682_v17  ;;  %666 = vmatpush3.bf16.msra.mxu1 %v682_v17 }
  0x22   :  { %279 = vmatmul.mubr.bf16.vlgmr.msra.gmra.mrb[0].mxu0 %v683_v18  ;;  %311 = vmatmul.mubr.bf16.vlgmr.msra.gmra.mrb[0].mxu1 %v686_v19 }
  0x23   :  { %286 = vmatprep.mubr.bf16.mxu0 %v689_v20  ;;  %318 = vmatprep.mubr.bf16.mxu1 %v691_v21 }
  0x2a   :  { %287 = vmatmul.mubr.bf16.gmra.mrb[4].mxu0 %v693_v22  ;;  %319 = vmatmul.mubr.bf16.gmra.mrb[4].mxu1 %v694_v23 }
  0x2b   :  { %294 = vmatprep.mubr.bf16.mxu0 %v695_v24  ;;  %326 = vmatprep.mubr.bf16.mxu1 %v697_v25 }
  0x32   :  { %295 = vmatmul.mubr.bf16.gmra.mrb[8].mxu0 %v699_v26  ;;  %327 = vmatmul.mubr.bf16.gmra.mrb[8].mxu1 %v700_v27 }
  0x33   :  { %302 = vmatprep.mubr.bf16.mxu0 %v701_v28  ;;  %334 = vmatprep.mubr.bf16.mxu1 %v703_v29 }
  0x3a   :  { %303 = vmatmul.mubr.bf16.gmra.mrb[12].mxu0 %v705_v30  ;;  %335 = vmatmul.mubr.bf16.gmra.mrb[12].mxu1 %v706_v31 }
  0xf5   :  { %v603_v32 = vpop.f32.mrb[0].mxu0  ;;  %v627_v33 = vpop.f32.mrb[0].mxu1 }
  0xf6   :  { %v604_v35 = vpop.f32.mrb[1].mxu0  ;;  %v628_v36 = vpop.f32.mrb[1].mxu1 }
  0xf7   :  { %v605_v37 = vadd.f32 %v604_v35, %v603_v32  ;;  %v629_v38 = vadd.f32 %v628_v36, %v627_v33  ;;  %v606_v39 = vpop.f32.mrb[2].mxu0  ;;  %v630_v40 = vpop.f32.mrb[2].mxu1 }
  0xf8   :  { %v607_v41 = vpop.f32.mrb[3].mxu0  ;;  %v631_v42 = vpop.f32.mrb[3].mxu1 }
  0xf9   :  { %v281_v43 = vadd.f32 %v605_v37, %v826_v34  ;;  %v313_v44 = vadd.f32 %v629_v38, %v826_v34  ;;  %v608_v45 = vadd.f32 %v607_v41, %v606_v39  ;;  %v632_v46 = vadd.f32 %v631_v42, %v630_v40 }
  0xfb   :  { %v359_v47 = vmul.f32 0.2, %v281_v43  ;;  %v367_v48 = vmul.f32 0.2, %v313_v44  ;;  %vm343_vm0 = vcmp.ge.f32.partialorder %v281_v43, 0.0  ;;  %vm351_vm1 = vcmp.ge.f32.partialorder %v313_v44, 0.0 }
  0xfc   :  { %v284_v49 = vadd.f32 %v608_v45, %v826_v34  ;;  %v316_v50 = vadd.f32 %v632_v46, %v826_v34 }
  0xfd   :  { %v609_v51 = vpop.f32.mrb[4].mxu0  ;;  %v633_v52 = vpop.f32.mrb[4].mxu1  ;;  %v375_v55 = vsel %vm343_vm0, %v281_v43, %v359_v47  ;;  %v383_v56 = vsel %vm351_vm1, %v313_v44, %v367_v48 }
  0xfe   :  { %vm344_vm2 = vcmp.ge.f32.partialorder %v284_v49, 0.0  ;;  %v360_v53 = vmul.f32 0.2, %v284_v49  ;;  %vm352_vm3 = vcmp.ge.f32.partialorder %v316_v50, 0.0  ;;  %v368_v54 = vmul.f32 0.2, %v316_v50 }
  0xff   :  { %v610_v57 = vpop.f32.mrb[5].mxu0  ;;  %v634_v58 = vpop.f32.mrb[5].mxu1 }
 0x100   :  { %v376_v59 = vsel %vm344_vm2, %v284_v49, %v360_v53  ;;  %v384_v60 = vsel %vm352_vm3, %v316_v50, %v368_v54  ;;  %v611_v61 = vadd.f32 %v610_v57, %v609_v51  ;;  %v635_v62 = vadd.f32 %v634_v58, %v633_v52  ;;  %v612_v63 = vpop.f32.mrb[6].mxu0  ;;  %v636_v0 = vpop.f32.mrb[6].mxu1 }
 0x101   :  { %v543_v1 = vpack.c.bf16 %v376_v59, %v375_v55  ;;  %v563_v2 = vpack.c.bf16 %v384_v60, %v383_v56  ;;  %v613_v3 = vpop.f32.mrb[7].mxu0  ;;  %v637_v4 = vpop.f32.mrb[7].mxu1 }
 0x102   :  { %v289_v5 = vadd.f32 %v611_v61, %v826_v34  ;;  %v321_v6 = vadd.f32 %v635_v62, %v826_v34  ;;  %v614_v7 = vadd.f32 %v613_v3, %v612_v63  ;;  %v638_v8 = vadd.f32 %v637_v4, %v636_v0 }
 0x103   :  { %544 = vst [vmem:[%s871_s3] sm:$0xff] %v543_v1   ;;  %583 = vst [vmem:[%s871_s3 + $0x20] sm:$0xff] %v563_v2  }
 0x104   :  { %v361_v9 = vmul.f32 0.2, %v289_v5  ;;  %v369_v10 = vmul.f32 0.2, %v321_v6  ;;  %v292_v11 = vadd.f32 %v614_v7, %v826_v34  ;;  %v324_v12 = vadd.f32 %v638_v8, %v826_v34 }
 0x105   :  { %v615_v13 = vpop.f32.mrb[8].mxu0  ;;  %v639_v14 = vpop.f32.mrb[8].mxu1  ;;  %vm345_vm4 = vcmp.ge.f32.partialorder %v289_v5, 0.0  ;;  %vm353_vm5 = vcmp.ge.f32.partialorder %v321_v6, 0.0 }
 0x106   :  { %v616_v15 = vpop.f32.mrb[9].mxu0  ;;  %v640_v16 = vpop.f32.mrb[9].mxu1  ;;  %vm346_vm6 = vcmp.ge.f32.partialorder %v292_v11, 0.0  ;;  %v362_v17 = vmul.f32 0.2, %v292_v11  ;;  %vm354_vm7 = vcmp.ge.f32.partialorder %v324_v12, 0.0  ;;  %v377_v23 = vsel %vm345_vm4, %v289_v5, %v361_v9 }
 0x107   :  { %v370_v18 = vmul.f32 0.2, %v324_v12  ;;  %v617_v19 = vadd.f32 %v616_v15, %v615_v13  ;;  %v641_v20 = vadd.f32 %v640_v16, %v639_v14  ;;  %v618_v21 = vpop.f32.mrb[10].mxu0  ;;  %v642_v22 = vpop.f32.mrb[10].mxu1  ;;  %v385_v24 = vsel %vm353_vm5, %v321_v6, %v369_v10 }
 0x108   :  { %v378_v25 = vsel %vm346_vm6, %v292_v11, %v362_v17  ;;  %v619_v27 = vpop.f32.mrb[11].mxu0  ;;  %v643_v28 = vpop.f32.mrb[11].mxu1 }
 0x109   :  { %v386_v26 = vsel %vm354_vm7, %v324_v12, %v370_v18  ;;  %v548_v29 = vpack.c.bf16 %v378_v25, %v377_v23  ;;  %v297_v31 = vadd.f32 %v617_v19, %v826_v34  ;;  %v329_v32 = vadd.f32 %v641_v20, %v826_v34 }
 0x10a   :  { %v568_v30 = vpack.c.bf16 %v386_v26, %v385_v24  ;;  %v620_v33 = vadd.f32 %v619_v27, %v618_v21  ;;  %v644_v35 = vadd.f32 %v643_v28, %v642_v22 }
 0x10b   :  { %580 = vst [vmem:[%s871_s3 + $0x8] sm:$0xff] %v548_v29   ;;  %v363_v36 = vmul.f32 0.2, %v297_v31  ;;  %v371_v37 = vmul.f32 0.2, %v329_v32  ;;  %vm347_vm8 = vcmp.ge.f32.partialorder %v297_v31, 0.0 }
 0x10c   :  { %584 = vst [vmem:[%s871_s3 + $0x28] sm:$0xff] %v568_v30   ;;  %v300_v38 = vadd.f32 %v620_v33, %v826_v34  ;;  %v332_v39 = vadd.f32 %v644_v35, %v826_v34  ;;  %vm355_vm9 = vcmp.ge.f32.partialorder %v329_v32, 0.0 }
 0x10d   :  { %v621_v40 = vpop.f32.mrb[12].mxu0  ;;  %v645_v41 = vpop.f32.mrb[12].mxu1  ;;  %v379_v50 = vsel %vm347_vm8, %v297_v31, %v363_v36  ;;  %v387_v51 = vsel %vm355_vm9, %v329_v32, %v371_v37 }
 0x10e   :  { %v622_v42 = vpop.f32.mrb[13].mxu0  ;;  %v646_v43 = vpop.f32.mrb[13].mxu1  ;;  %vm348_vm10 = vcmp.ge.f32.partialorder %v300_v38, 0.0  ;;  %v364_v44 = vmul.f32 0.2, %v300_v38  ;;  %vm356_vm11 = vcmp.ge.f32.partialorder %v332_v39, 0.0 }
 0x10f   :  { %v372_v45 = vmul.f32 0.2, %v332_v39  ;;  %v623_v46 = vadd.f32 %v622_v42, %v621_v40  ;;  %v647_v47 = vadd.f32 %v646_v43, %v645_v41  ;;  %v624_v48 = vpop.f32.mrb[14].mxu0  ;;  %v648_v49 = vpop.f32.mrb[14].mxu1 }
 0x110   :  { %v380_v52 = vsel %vm348_vm10, %v300_v38, %v364_v44  ;;  %v625_v54 = vpop.f32.mrb[15].mxu0  ;;  %v649_v55 = vpop.f32.mrb[15].mxu1 }
 0x111   :  { %v388_v53 = vsel %vm356_vm11, %v332_v39, %v372_v45  ;;  %v553_v56 = vpack.c.bf16 %v380_v52, %v379_v50  ;;  %v305_v58 = vadd.f32 %v623_v46, %v826_v34  ;;  %v337_v59 = vadd.f32 %v647_v47, %v826_v34 }
 0x112   :  { %v573_v57 = vpack.c.bf16 %v388_v53, %v387_v51  ;;  %v626_v60 = vadd.f32 %v625_v54, %v624_v48  ;;  %v650_v61 = vadd.f32 %v649_v55, %v648_v49 }
 0x113   :  { %581 = vst [vmem:[%s871_s3 + $0x10] sm:$0xff] %v553_v56   ;;  %v365_v62 = vmul.f32 0.2, %v305_v58  ;;  %v373_v63 = vmul.f32 0.2, %v337_v59  ;;  %vm349_vm12 = vcmp.ge.f32.partialorder %v305_v58, 0.0 }
 0x114   :  { %585 = vst [vmem:[%s871_s3 + $0x30] sm:$0xff] %v573_v57   ;;  %v308_v0 = vadd.f32 %v626_v60, %v826_v34  ;;  %v340_v1 = vadd.f32 %v650_v61, %v826_v34  ;;  %vm357_vm13 = vcmp.ge.f32.partialorder %v337_v59, 0.0 }
 0x115   :  { %v381_v4 = vsel %vm349_vm12, %v305_v58, %v365_v62  ;;  %v389_v5 = vsel %vm357_vm13, %v337_v59, %v373_v63 }
 0x116   :  { %vm350_vm14 = vcmp.ge.f32.partialorder %v308_v0, 0.0  ;;  %v366_v2 = vmul.f32 0.2, %v308_v0  ;;  %vm358_vm15 = vcmp.ge.f32.partialorder %v340_v1, 0.0  ;;  %v374_v3 = vmul.f32 0.2, %v340_v1 }
 0x118   :  { %v382_v6 = vsel %vm350_vm14, %v308_v0, %v366_v2  ;;  %v390_v7 = vsel %vm358_vm15, %v340_v1, %v374_v3 }
 0x119   :  { %v558_v8 = vpack.c.bf16 %v382_v6, %v381_v4  ;;  %v578_v9 = vpack.c.bf16 %v390_v7, %v389_v5 }
 0x11b   :  { %582 = vst [vmem:[%s871_s3 + $0x18] sm:$0xff] %v558_v8   ;;  %586 = vst [vmem:[%s871_s3 + $0x38] sm:$0xff] %v578_v9  }

// kernel: forward.8
= control target key start
LH: loop header
LB: loop body
LE: loop exit
PB: predicated region body
PF: predicated region fallthrough
CT: control target
= control target key end

     0   :  { %s769_s1 = inlined_call_operand.vmem [shape: bf16[512,128], index: 1, kind: input, shape index: {}]   ;;  %s770_s0 = inlined_call_operand.vmem [shape: bf16[32,512], index: 0, kind: input, shape index: {}]   ;;  %s771_s2 = inlined_call_operand.vmem [shape: f32[1,128], index: 2, kind: input, shape index: {}]   ;;  %s772_s3 = inlined_call_operand.vmem [shape: bf16[32,128], index: 3, kind: output, shape index: {}]  }
   0x1   :  { %v576_v0 = vld [vmem:[%s769_s1 + $0x40] sm:$0xff]   ;;  %v580_v4 = vld [vmem:[%s769_s1 + $0x48] sm:$0xff]   ;;  %v584_v8 = vld [vmem:[%s769_s1 + $0x50] sm:$0xff]  }
   0x2   :  { %v577_v1 = vld [vmem:[%s769_s1 + $0xc0] sm:$0xff]   ;;  %520 = vmatprep.subr.bf16.mxu0 %v576_v0  ;;  %v581_v5 = vld [vmem:[%s769_s1 + $0xc8] sm:$0xff]   ;;  %v585_v9 = vld [vmem:[%s769_s1 + $0xd0] sm:$0xff]  }
   0x3   :  { %v578_v2 = vld [vmem:[%s769_s1] sm:$0xff]   ;;  %548 = vmatprep.subr.bf16.mxu1 %v577_v1  ;;  %v582_v6 = vld [vmem:[%s769_s1 + $0x8] sm:$0xff]   ;;  %v586_v10 = vld [vmem:[%s769_s1 + $0x10] sm:$0xff]  }
   0x4   :  { %v579_v3 = vld [vmem:[%s769_s1 + $0x80] sm:$0xff]   ;;  %521 = vmatpush3.bf16.msra.mxu0 %v578_v2  ;;  %v583_v7 = vld [vmem:[%s769_s1 + $0x88] sm:$0xff]   ;;  %v587_v11 = vld [vmem:[%s769_s1 + $0x90] sm:$0xff]  }
   0x5   :  { %549 = vmatpush3.bf16.msra.mxu1 %v579_v3  ;;  %522 = vmatprep.subr.bf16.mxu0 %v580_v4  ;;  %v588_v12 = vld [vmem:[%s769_s1 + $0x58] sm:$0xff]   ;;  %v592_v16 = vld [vmem:[%s769_s1 + $0x60] sm:$0xff]   ;;  %v596_v20 = vld [vmem:[%s769_s1 + $0x68] sm:$0xff]  }
   0x6   :  { %550 = vmatprep.subr.bf16.mxu1 %v581_v5  ;;  %v589_v13 = vld [vmem:[%s769_s1 + $0xd8] sm:$0xff]   ;;  %v593_v17 = vld [vmem:[%s769_s1 + $0xe0] sm:$0xff]   ;;  %v597_v21 = vld [vmem:[%s769_s1 + $0xe8] sm:$0xff]  }
   0x7   :  { %v590_v14 = vld [vmem:[%s769_s1 + $0x18] sm:$0xff]   ;;  %v594_v18 = vld [vmem:[%s769_s1 + $0x20] sm:$0xff]   ;;  %v598_v22 = vld [vmem:[%s769_s1 + $0x28] sm:$0xff]  }
   0x8   :  { %523 = vmatpush3.bf16.msra.mxu0 %v582_v6  ;;  %v591_v15 = vld [vmem:[%s769_s1 + $0x98] sm:$0xff]   ;;  %v595_v19 = vld [vmem:[%s769_s1 + $0xa0] sm:$0xff]   ;;  %v599_v23 = vld [vmem:[%s769_s1 + $0xa8] sm:$0xff]  }
   0x9   :  { %551 = vmatpush3.bf16.msra.mxu1 %v583_v7  ;;  %524 = vmatprep.subr.bf16.mxu0 %v584_v8  ;;  %v600_v24 = vld [vmem:[%s769_s1 + $0x70] sm:$0xff]   ;;  %v604_v28 = vld [vmem:[%s769_s1 + $0x78] sm:$0xff]   ;;  %v460_v42 = vld [vmem:[%s771_s2] ss:$0 sm:$0xff] }
   0xa   :  { %552 = vmatprep.subr.bf16.mxu1 %v585_v9  ;;  %v601_v25 = vld [vmem:[%s769_s1 + $0xf0] sm:$0xff]   ;;  %v605_v29 = vld [vmem:[%s769_s1 + $0xf8] sm:$0xff]  }
   0xb   :  { %v602_v26 = vld [vmem:[%s769_s1 + $0x30] sm:$0xff]   ;;  %v606_v30 = vld [vmem:[%s769_s1 + $0x38] sm:$0xff]  }
   0xc   :  { %525 = vmatpush3.bf16.msra.mxu0 %v586_v10  ;;  %v603_v27 = vld [vmem:[%s769_s1 + $0xb0] sm:$0xff]   ;;  %v607_v31 = vld [vmem:[%s769_s1 + $0xb8] sm:$0xff]  }
   0xd   :  { %553 = vmatpush3.bf16.msra.mxu1 %v587_v11  ;;  %526 = vmatprep.subr.bf16.mxu0 %v588_v12  ;;  %v608_v32 = vld [vmem:[%s770_s0] ss:$16 sps:$4 sm:$0xff]   ;;  %v610_v33 = vld [vmem:[%s770_s0 + $0x4] ss:$16 sps:$4 sm:$0xff]   ;;  %v611_v34 = vld [vmem:[%s770_s0 + $0x8] ss:$16 sps:$4 sm:$0xff]  }
   0xe   :  { %554 = vmatprep.subr.bf16.mxu1 %v589_v13  ;;  %v613_v35 = vld [vmem:[%s770_s0 + $0xc] ss:$16 sps:$4 sm:$0xff]   ;;  %358 = vmatprep.mubr.bf16.mxu0 %v610_v33  ;;  %v614_v36 = vld [vmem:[%s770_s0 + $0x24] ss:$16 sps:$4 sm:$0xff]   ;;  %v618_v38 = vld [vmem:[%s770_s0 + $0x20] ss:$16 sps:$4 sm:$0xff]  }
   0xf   :  { %407 = vmatprep.mubr.bf16.mxu1 %v613_v35  ;;  %v616_v37 = vld [vmem:[%s770_s0 + $0x2c] ss:$16 sps:$4 sm:$0xff]   ;;  %v619_v39 = vld [vmem:[%s770_s0 + $0x28] ss:$16 sps:$4 sm:$0xff]  }
  0x10   :  { %527 = vmatpush3.bf16.msra.mxu0 %v590_v14 }
  0x11   :  { %555 = vmatpush3.bf16.msra.mxu1 %v591_v15  ;;  %528 = vmatprep.subr.bf16.mxu0 %v592_v16 }
  0x12   :  { %556 = vmatprep.subr.bf16.mxu1 %v593_v17 }
  0x14   :  { %529 = vmatpush3.bf16.msra.mxu0 %v594_v18 }
  0x15   :  { %557 = vmatpush3.bf16.msra.mxu1 %v595_v19  ;;  %530 = vmatprep.subr.bf16.mxu0 %v596_v20 }
  0x16   :  { %558 = vmatprep.subr.bf16.mxu1 %v597_v21 }
  0x18   :  { %531 = vmatpush3.bf16.msra.mxu0 %v598_v22 }
  0x19   :  { %559 = vmatpush3.bf16.msra.mxu1 %v599_v23  ;;  %532 = vmatprep.subr.bf16.mxu0 %v600_v24 }
  0x1a   :  { %560 = vmatprep.subr.bf16.mxu1 %v601_v25 }
  0x1c   :  { %533 = vmatpush3.bf16.msra.mxu0 %v602_v26 }
  0x1d   :  { %561 = vmatpush3.bf16.msra.mxu1 %v603_v27  ;;  %534 = vmatprep.subr.bf16.mxu0 %v604_v28 }
  0x1e   :  { %562 = vmatprep.subr.bf16.mxu1 %v605_v29 }
  0x20   :  { %535 = vmatpush3.bf16.msra.mxu0 %v606_v30 }
  0x21   :  { %563 = vmatpush3.bf16.msra.mxu1 %v607_v31 }
  0x23   :  { %359 = vmatmul.mubr.bf16.vlgmr.msra.gmra.mrb[0].mxu0 %v608_v32 }
  0x24   :  { %408 = vmatmul.mubr.bf16.vlgmr.msra.gmra.mrb[0].mxu1 %v611_v34  ;;  %366 = vmatprep.mubr.bf16.mxu0 %v614_v36 }
  0x25   :  { %415 = vmatprep.mubr.bf16.mxu1 %v616_v37 }
  0x2b   :  { %367 = vmatmul.mubr.bf16.gmra.mrb[4].mxu0 %v618_v38 }
  0x2c   :  { %416 = vmatmul.mubr.bf16.gmra.mrb[4].mxu1 %v619_v39 }
  0xf6   :  { %v536_v40 = vpop.f32.mrb[0].mxu0 }
  0xf7   :  { %v564_v41 = vpop.f32.mrb[0].mxu1  ;;  %v537_v43 = vpop.f32.mrb[1].mxu0 }
  0xf8   :  { %v538_v44 = vadd.f32 %v537_v43, %v536_v40  ;;  %v565_v45 = vpop.f32.mrb[1].mxu1  ;;  %v539_v46 = vpop.f32.mrb[2].mxu0 }
  0xf9   :  { %v566_v47 = vadd.f32 %v565_v45, %v564_v41  ;;  %v567_v48 = vpop.f32.mrb[2].mxu1  ;;  %v540_v49 = vpop.f32.mrb[3].mxu0 }
  0xfa   :  { %v361_v50 = vadd.f32 %v538_v44, %v460_v42  ;;  %v541_v51 = vadd.f32 %v540_v49, %v539_v46  ;;  %v568_v52 = vpop.f32.mrb[3].mxu1 }
  0xfb   :  { %v569_v53 = vadd.f32 %v568_v52, %v567_v48 }
  0xfc   :  { %v410_v54 = vadd.f32 %v566_v47, %v361_v50  ;;  %v364_v55 = vadd.f32 %v541_v51, %v460_v42 }
  0xfe   :  { %v428_v56 = vmul.f32 0.2, %v410_v54  ;;  %v413_v57 = vadd.f32 %v569_v53, %v364_v55  ;;  %v542_v58 = vpop.f32.mrb[4].mxu0  ;;  %vm424_vm0 = vcmp.ge.f32.partialorder %v410_v54, 0.0 }
  0xff   :  { %v570_v59 = vpop.f32.mrb[4].mxu1  ;;  %v543_v60 = vpop.f32.mrb[5].mxu0 }
 0x100   :  { %vm425_vm1 = vcmp.ge.f32.partialorder %v413_v57, 0.0  ;;  %v429_v61 = vmul.f32 0.2, %v413_v57  ;;  %v544_v62 = vadd.f32 %v543_v60, %v542_v58  ;;  %v571_v63 = vpop.f32.mrb[5].mxu1  ;;  %v545_v0 = vpop.f32.mrb[6].mxu0  ;;  %v432_v4 = vsel %vm424_vm0, %v410_v54, %v428_v56 }
 0x101   :  { %v572_v1 = vadd.f32 %v571_v63, %v570_v59  ;;  %v573_v2 = vpop.f32.mrb[6].mxu1  ;;  %v546_v3 = vpop.f32.mrb[7].mxu0 }
 0x102   :  { %v433_v5 = vsel %vm425_vm1, %v413_v57, %v429_v61  ;;  %v369_v6 = vadd.f32 %v544_v62, %v460_v42  ;;  %v547_v7 = vadd.f32 %v546_v3, %v545_v0  ;;  %v574_v8 = vpop.f32.mrb[7].mxu1 }
 0x103   :  { %v512_v9 = vpack.c.bf16 %v433_v5, %v432_v4  ;;  %v575_v10 = vadd.f32 %v574_v8, %v573_v2 }
 0x104   :  { %v418_v11 = vadd.f32 %v572_v1, %v369_v6  ;;  %v372_v12 = vadd.f32 %v547_v7, %v460_v42 }
 0x105   :  { %513 = vst [vmem:[%s772_s3] sm:$0xff] %v512_v9  }
 0x106   :  { %v430_v13 = vmul.f32 0.2, %v418_v11  ;;  %v421_v14 = vadd.f32 %v575_v10, %v372_v12  ;;  %vm426_vm2 = vcmp.ge.f32.partialorder %v418_v11, 0.0 }
 0x108   :  { %vm427_vm3 = vcmp.ge.f32.partialorder %v421_v14, 0.0  ;;  %v431_v15 = vmul.f32 0.2, %v421_v14  ;;  %v434_v16 = vsel %vm426_vm2, %v418_v11, %v430_v13 }
 0x10a   :  { %v435_v17 = vsel %vm427_vm3, %v421_v14, %v431_v15 }
 0x10b   :  { %v517_v18 = vpack.c.bf16 %v435_v17, %v434_v16 }
 0x10d   :  { %519 = vst [vmem:[%s772_s3 + $0x8] sm:$0xff] %v517_v18  }

// kernel: forward.9
= control target key start
LH: loop header
LB: loop body
LE: loop exit
PB: predicated region body
PF: predicated region fallthrough
CT: control target
= control target key end

     0   :  { %s1244_s1 = inlined_call_operand.vmem [shape: bf16[1024,128], index: 1, kind: input, shape index: {}]   ;;  %s1245_s0 = inlined_call_operand.vmem [shape: bf16[16,1024], index: 0, kind: input, shape index: {}]   ;;  %s1246_s2 = inlined_call_operand.vmem [shape: f32[1,128], index: 2, kind: input, shape index: {}]   ;;  %s1247_s3 = inlined_call_operand.vmem [shape: f32[16,128], index: 3, kind: output, shape index: {}]  }
   0x1   :  { %v927_v0 = vld [vmem:[%s1244_s1 + $0x40] sm:$0xff]   ;;  %v931_v4 = vld [vmem:[%s1244_s1 + $0x48] sm:$0xff]   ;;  %v935_v8 = vld [vmem:[%s1244_s1 + $0x50] sm:$0xff]  }
   0x2   :  { %v928_v1 = vld [vmem:[%s1244_s1 + $0xc0] sm:$0xff]   ;;  %839 = vmatprep.subr.bf16.mxu0 %v927_v0  ;;  %v932_v5 = vld [vmem:[%s1244_s1 + $0xc8] sm:$0xff]   ;;  %v936_v9 = vld [vmem:[%s1244_s1 + $0xd0] sm:$0xff]  }
   0x3   :  { %v929_v2 = vld [vmem:[%s1244_s1] sm:$0xff]   ;;  %861 = vmatprep.subr.bf16.mxu1 %v928_v1  ;;  %v933_v6 = vld [vmem:[%s1244_s1 + $0x8] sm:$0xff]   ;;  %v937_v10 = vld [vmem:[%s1244_s1 + $0x10] sm:$0xff]  }
   0x4   :  { %v930_v3 = vld [vmem:[%s1244_s1 + $0x80] sm:$0xff]   ;;  %840 = vmatpush3.bf16.msra.mxu0 %v929_v2  ;;  %v934_v7 = vld [vmem:[%s1244_s1 + $0x88] sm:$0xff]   ;;  %v938_v11 = vld [vmem:[%s1244_s1 + $0x90] sm:$0xff]  }
   0x5   :  { %862 = vmatpush3.bf16.msra.mxu1 %v930_v3  ;;  %841 = vmatprep.subr.bf16.mxu0 %v931_v4  ;;  %v939_v12 = vld [vmem:[%s1244_s1 + $0x58] sm:$0xff]   ;;  %v943_v16 = vld [vmem:[%s1244_s1 + $0x60] sm:$0xff]   ;;  %v947_v20 = vld [vmem:[%s1244_s1 + $0x68] sm:$0xff]  }
   0x6   :  { %863 = vmatprep.subr.bf16.mxu1 %v932_v5  ;;  %v940_v13 = vld [vmem:[%s1244_s1 + $0xd8] sm:$0xff]   ;;  %v944_v17 = vld [vmem:[%s1244_s1 + $0xe0] sm:$0xff]   ;;  %v948_v21 = vld [vmem:[%s1244_s1 + $0xe8] sm:$0xff]  }
   0x7   :  { %v941_v14 = vld [vmem:[%s1244_s1 + $0x18] sm:$0xff]   ;;  %v945_v18 = vld [vmem:[%s1244_s1 + $0x20] sm:$0xff]   ;;  %v949_v22 = vld [vmem:[%s1244_s1 + $0x28] sm:$0xff]  }
   0x8   :  { %842 = vmatpush3.bf16.msra.mxu0 %v933_v6  ;;  %v942_v15 = vld [vmem:[%s1244_s1 + $0x98] sm:$0xff]   ;;  %v946_v19 = vld [vmem:[%s1244_s1 + $0xa0] sm:$0xff]   ;;  %v950_v23 = vld [vmem:[%s1244_s1 + $0xa8] sm:$0xff]  }
   0x9   :  { %864 = vmatpush3.bf16.msra.mxu1 %v934_v7  ;;  %843 = vmatprep.subr.bf16.mxu0 %v935_v8  ;;  %v951_v24 = vld [vmem:[%s1244_s1 + $0x70] sm:$0xff]   ;;  %v955_v28 = vld [vmem:[%s1244_s1 + $0x78] sm:$0xff]   ;;  %v15_v32 = vld [vmem:[%s1245_s0] sm:$0xff] }
   0xa   :  { %865 = vmatprep.subr.bf16.mxu1 %v936_v9  ;;  %v952_v25 = vld [vmem:[%s1244_s1 + $0xf0] sm:$0xff]   ;;  %v956_v29 = vld [vmem:[%s1244_s1 + $0xf8] sm:$0xff]   ;;  %v19_v33 = vld [vmem:[%s1245_s0 + $0x20] sm:$0xff] }
   0xb   :  { %v953_v26 = vld [vmem:[%s1244_s1 + $0x30] sm:$0xff]   ;;  %v957_v30 = vld [vmem:[%s1244_s1 + $0x38] sm:$0xff]   ;;  %v16_v34 = vld [vmem:[%s1245_s0 + $0x8] sm:$0xff]  ;;  %v765_v35 = vcombine.low %v15_v32, %v19_v33  ;;  %v766_v36 = vcombine.high %v15_v32, %v19_v33 }
   0xc   :  { %844 = vmatpush3.bf16.msra.mxu0 %v937_v10  ;;  %v954_v27 = vld [vmem:[%s1244_s1 + $0xb0] sm:$0xff]   ;;  %v958_v31 = vld [vmem:[%s1244_s1 + $0xb8] sm:$0xff]   ;;  %v20_v37 = vld [vmem:[%s1245_s0 + $0x28] sm:$0xff] }
   0xd   :  { %866 = vmatpush3.bf16.msra.mxu1 %v938_v11  ;;  %845 = vmatprep.subr.bf16.mxu0 %v939_v12  ;;  %v767_v38 = vcombine.low %v16_v34, %v20_v37  ;;  %v768_v39 = vcombine.high %v16_v34, %v20_v37  ;;  %v959_v40 = vld [vmem:[%s1244_s1 + $0x140] sm:$0xff]   ;;  %v963_v44 = vld [vmem:[%s1244_s1 + $0x148] sm:$0xff]   ;;  %v967_v48 = vld [vmem:[%s1244_s1 + $0x150] sm:$0xff]  }
   0xe   :  { %867 = vmatprep.subr.bf16.mxu1 %v940_v13  ;;  %614 = vmatprep.mubr.bf16.mxu0 %v766_v36  ;;  %v960_v41 = vld [vmem:[%s1244_s1 + $0x1c0] sm:$0xff]   ;;  %v964_v45 = vld [vmem:[%s1244_s1 + $0x1c8] sm:$0xff]   ;;  %v968_v49 = vld [vmem:[%s1244_s1 + $0x1d0] sm:$0xff]  }
   0xf   :  { %655 = vmatprep.mubr.bf16.mxu1 %v768_v39  ;;  %v961_v42 = vld [vmem:[%s1244_s1 + $0x100] sm:$0xff]   ;;  %v965_v46 = vld [vmem:[%s1244_s1 + $0x108] sm:$0xff]   ;;  %v969_v50 = vld [vmem:[%s1244_s1 + $0x110] sm:$0xff]  }
  0x10   :  { %846 = vmatpush3.bf16.msra.mxu0 %v941_v14  ;;  %v962_v43 = vld [vmem:[%s1244_s1 + $0x180] sm:$0xff]   ;;  %v966_v47 = vld [vmem:[%s1244_s1 + $0x188] sm:$0xff]   ;;  %v970_v51 = vld [vmem:[%s1244_s1 + $0x190] sm:$0xff]  }
  0x11   :  { %868 = vmatpush3.bf16.msra.mxu1 %v942_v15  ;;  %847 = vmatprep.subr.bf16.mxu0 %v943_v16  ;;  %v971_v52 = vld [vmem:[%s1244_s1 + $0x158] sm:$0xff]   ;;  %v975_v56 = vld [vmem:[%s1244_s1 + $0x160] sm:$0xff]   ;;  %v979_v60 = vld [vmem:[%s1244_s1 + $0x168] sm:$0xff]  }
  0x12   :  { %869 = vmatprep.subr.bf16.mxu1 %v944_v17  ;;  %v972_v53 = vld [vmem:[%s1244_s1 + $0x1d8] sm:$0xff]   ;;  %v976_v57 = vld [vmem:[%s1244_s1 + $0x1e0] sm:$0xff]   ;;  %v980_v61 = vld [vmem:[%s1244_s1 + $0x1e8] sm:$0xff]  }
  0x13   :  { %v973_v54 = vld [vmem:[%s1244_s1 + $0x118] sm:$0xff]   ;;  %v977_v58 = vld [vmem:[%s1244_s1 + $0x120] sm:$0xff]   ;;  %v981_v62 = vld [vmem:[%s1244_s1 + $0x128] sm:$0xff]  }
  0x14   :  { %848 = vmatpush3.bf16.msra.mxu0 %v945_v18  ;;  %v974_v55 = vld [vmem:[%s1244_s1 + $0x198] sm:$0xff]   ;;  %v978_v59 = vld [vmem:[%s1244_s1 + $0x1a0] sm:$0xff]   ;;  %v982_v63 = vld [vmem:[%s1244_s1 + $0x1a8] sm:$0xff]  }
  0x15   :  { %870 = vmatpush3.bf16.msra.mxu1 %v946_v19  ;;  %849 = vmatprep.subr.bf16.mxu0 %v947_v20  ;;  %v983_v0 = vld [vmem:[%s1244_s1 + $0x170] sm:$0xff]   ;;  %v987_v4 = vld [vmem:[%s1244_s1 + $0x178] sm:$0xff]   ;;  %v764_v18 = vld [vmem:[%s1246_s2] ss:$0 sm:$0xff] }
  0x16   :  { %871 = vmatprep.subr.bf16.mxu1 %v948_v21  ;;  %v984_v1 = vld [vmem:[%s1244_s1 + $0x1f0] sm:$0xff]   ;;  %v988_v5 = vld [vmem:[%s1244_s1 + $0x1f8] sm:$0xff]  }
  0x17   :  { %v985_v2 = vld [vmem:[%s1244_s1 + $0x130] sm:$0xff]   ;;  %v989_v6 = vld [vmem:[%s1244_s1 + $0x138] sm:$0xff]  }
  0x18   :  { %850 = vmatpush3.bf16.msra.mxu0 %v949_v22  ;;  %v986_v3 = vld [vmem:[%s1244_s1 + $0x1b0] sm:$0xff]   ;;  %v990_v7 = vld [vmem:[%s1244_s1 + $0x1b8] sm:$0xff]  }
  0x19   :  { %872 = vmatpush3.bf16.msra.mxu1 %v950_v23  ;;  %851 = vmatprep.subr.bf16.mxu0 %v951_v24  ;;  %v17_v8 = vld [vmem:[%s1245_s0 + $0x10] sm:$0xff]  ;;  %v18_v12 = vld [vmem:[%s1245_s0 + $0x18] sm:$0xff] }
  0x1a   :  { %873 = vmatprep.subr.bf16.mxu1 %v952_v25  ;;  %v21_v9 = vld [vmem:[%s1245_s0 + $0x30] sm:$0xff]  ;;  %v22_v13 = vld [vmem:[%s1245_s0 + $0x38] sm:$0xff] }
  0x1b   :  { %v769_v10 = vcombine.low %v17_v8, %v21_v9  ;;  %v770_v11 = vcombine.high %v17_v8, %v21_v9  ;;  %v771_v14 = vcombine.low %v18_v12, %v22_v13  ;;  %v772_v15 = vcombine.high %v18_v12, %v22_v13 }
  0x1c   :  { %852 = vmatpush3.bf16.msra.mxu0 %v953_v26 }
  0x1d   :  { %874 = vmatpush3.bf16.msra.mxu1 %v954_v27  ;;  %853 = vmatprep.subr.bf16.mxu0 %v955_v28 }
  0x1e   :  { %875 = vmatprep.subr.bf16.mxu1 %v956_v29 }
  0x20   :  { %854 = vmatpush3.bf16.msra.mxu0 %v957_v30 }
  0x21   :  { %876 = vmatpush3.bf16.msra.mxu1 %v958_v31  ;;  %883 = vmatprep.subr.bf16.mxu0 %v959_v40 }
  0x22   :  { %905 = vmatprep.subr.bf16.mxu1 %v960_v41 }
  0x23   :  { %615 = vmatmul.mubr.bf16.vlgmr.msra.gmra.mrb[0].mxu0 %v765_v35 }
  0x24   :  { %656 = vmatmul.mubr.bf16.vlgmr.msra.gmra.mrb[0].mxu1 %v767_v38  ;;  %884 = vmatpush3.bf16.msra.mxu0 %v961_v42 }
  0x25   :  { %906 = vmatpush3.bf16.msra.mxu1 %v962_v43  ;;  %885 = vmatprep.subr.bf16.mxu0 %v963_v44 }
  0x26   :  { %907 = vmatprep.subr.bf16.mxu1 %v964_v45  ;;  %696 = vmatprep.mubr.bf16.mxu0 %v770_v11 }
  0x27   :  { %737 = vmatprep.mubr.bf16.mxu1 %v772_v15 }
  0x28   :  { %886 = vmatpush3.bf16.msra.mxu0 %v965_v46 }
  0x29   :  { %908 = vmatpush3.bf16.msra.mxu1 %v966_v47  ;;  %887 = vmatprep.subr.bf16.mxu0 %v967_v48 }
  0x2a   :  { %909 = vmatprep.subr.bf16.mxu1 %v968_v49 }
  0x2c   :  { %888 = vmatpush3.bf16.msra.mxu0 %v969_v50 }
  0x2d   :  { %910 = vmatpush3.bf16.msra.mxu1 %v970_v51  ;;  %889 = vmatprep.subr.bf16.mxu0 %v971_v52 }
  0x2e   :  { %911 = vmatprep.subr.bf16.mxu1 %v972_v53 }
  0x30   :  { %890 = vmatpush3.bf16.msra.mxu0 %v973_v54 }
  0x31   :  { %912 = vmatpush3.bf16.msra.mxu1 %v974_v55  ;;  %891 = vmatprep.subr.bf16.mxu0 %v975_v56 }
  0x32   :  { %913 = vmatprep.subr.bf16.mxu1 %v976_v57 }
  0x34   :  { %892 = vmatpush3.bf16.msra.mxu0 %v977_v58 }
  0x35   :  { %914 = vmatpush3.bf16.msra.mxu1 %v978_v59  ;;  %893 = vmatprep.subr.bf16.mxu0 %v979_v60 }
  0x36   :  { %915 = vmatprep.subr.bf16.mxu1 %v980_v61 }
  0x38   :  { %894 = vmatpush3.bf16.msra.mxu0 %v981_v62 }
  0x39   :  { %916 = vmatpush3.bf16.msra.mxu1 %v982_v63  ;;  %895 = vmatprep.subr.bf16.mxu0 %v983_v0 }
  0x3a   :  { %917 = vmatprep.subr.bf16.mxu1 %v984_v1 }
  0x3c   :  { %896 = vmatpush3.bf16.msra.mxu0 %v985_v2 }
  0x3d   :  { %918 = vmatpush3.bf16.msra.mxu1 %v986_v3  ;;  %897 = vmatprep.subr.bf16.mxu0 %v987_v4 }
  0x3e   :  { %919 = vmatprep.subr.bf16.mxu1 %v988_v5 }
  0x40   :  { %898 = vmatpush3.bf16.msra.mxu0 %v989_v6 }
  0x41   :  { %920 = vmatpush3.bf16.msra.mxu1 %v990_v7 }
  0x43   :  { %697 = vmatmul.mubr.bf16.vlgmr.msra.gmra.mrb[4].mxu0 %v769_v10 }
  0x44   :  { %738 = vmatmul.mubr.bf16.vlgmr.msra.gmra.mrb[4].mxu1 %v771_v14 }
  0xf6   :  { %v855_v16 = vpop.f32.mrb[0].mxu0 }
  0xf7   :  { %v877_v17 = vpop.f32.mrb[0].mxu1  ;;  %v856_v19 = vpop.f32.mrb[1].mxu0 }
  0xf8   :  { %v857_v20 = vadd.f32 %v856_v19, %v855_v16  ;;  %v878_v21 = vpop.f32.mrb[1].mxu1  ;;  %v858_v22 = vpop.f32.mrb[2].mxu0 }
  0xf9   :  { %v879_v23 = vadd.f32 %v878_v21, %v877_v17  ;;  %v880_v24 = vpop.f32.mrb[2].mxu1  ;;  %v859_v25 = vpop.f32.mrb[3].mxu0 }
  0xfa   :  { %v617_v26 = vadd.f32 %v857_v20, %v764_v18  ;;  %v860_v27 = vadd.f32 %v859_v25, %v858_v22  ;;  %v881_v28 = vpop.f32.mrb[3].mxu1 }
  0xfb   :  { %v882_v29 = vadd.f32 %v881_v28, %v880_v24 }
  0xfc   :  { %v658_v30 = vadd.f32 %v879_v23, %v617_v26  ;;  %v620_v31 = vadd.f32 %v860_v27, %v764_v18 }
  0xfe   :  { %v661_v32 = vadd.f32 %v882_v29, %v620_v31 }
 0x116   :  { %v899_v33 = vpop.f32.mrb[4].mxu0 }
 0x117   :  { %v921_v34 = vpop.f32.mrb[4].mxu1  ;;  %v900_v35 = vpop.f32.mrb[5].mxu0 }
 0x118   :  { %v901_v36 = vadd.f32 %v900_v35, %v899_v33  ;;  %v922_v37 = vpop.f32.mrb[5].mxu1  ;;  %v902_v38 = vpop.f32.mrb[6].mxu0 }
 0x119   :  { %v923_v39 = vadd.f32 %v922_v37, %v921_v34  ;;  %v924_v40 = vpop.f32.mrb[6].mxu1  ;;  %v903_v41 = vpop.f32.mrb[7].mxu0 }
 0x11a   :  { %v699_v42 = vadd.f32 %v901_v36, %v658_v30  ;;  %v904_v43 = vadd.f32 %v903_v41, %v902_v38  ;;  %v925_v44 = vpop.f32.mrb[7].mxu1 }
 0x11b   :  { %v926_v45 = vadd.f32 %v925_v44, %v924_v40 }
 0x11c   :  { %v740_v46 = vadd.f32 %v923_v39, %v699_v42  ;;  %v702_v47 = vadd.f32 %v904_v43, %v661_v32 }
 0x11e   :  { %v837_v48 = vmul.f32 -1.442695, %v740_v46  ;;  %v743_v49 = vadd.f32 %v926_v45, %v702_v47 }
 0x120   :  { %991 = vpow2.f32 %v837_v48  ;;  %v838_v50 = vmul.f32 -1.442695, %v743_v49 }
 0x122   :  { %993 = vpow2.f32 %v838_v50 }
 0x12a   :  { %v992_v51 = vpop.eup %991 }
 0x12b   :  { %v752_v52 = vadd.f32 1.0, %v992_v51 }
 0x12c   :  { %v994_v53 = vpop.eup %993 }
 0x12d   :  { %995 = vrcp.f32 %v752_v52  ;;  %v753_v54 = vadd.f32 1.0, %v994_v53 }
 0x12f   :  { %997 = vrcp.f32 %v753_v54 }
 0x137   :  { %v996_v55 = vpop.eup %995 }
 0x138   :  { %758 = vst [vmem:[%s1247_s3] sm:$0xff] %v996_v55 }
 0x139   :  { %v998_v56 = vpop.eup %997 }
 0x13a   :  { %759 = vst [vmem:[%s1247_s3 + $0x8] sm:$0xff] %v998_v56 }

</bundles_post_ra>
